<compile_context>
chip_gen: v7x
topology: tpu7x:2x2x1
jax: 0.10.0
libtpu: 0.0.40
codegen_flags: <defaults>
</compile_context>

<pallas_src>
import functools

import jax
import jax.numpy as jnp
import numpy as np
from jax.experimental import pallas as pl
from jax.experimental.pallas import tpu as pltpu


def music_rnn_kernel(xf_ref, h0_ref, c0_ref,
                     wih0_ref, whh0_ref, b0_ref,
                     w1_ref, b1_ref,
                     wfc_ref, bfc_ref,
                     out_ref, state_ref,
                     *, hidden_size, seq_len, batch):
    """Stacked 2-layer LSTM over T steps + FC on the final hidden state."""
    H = hidden_size
    T = seq_len
    B = batch

    whh0 = whh0_ref[...]                # (H, 4H)   layer-0 recurrent weights
    w1 = w1_ref[...]                    # (2H, 4H)  fused [W_ih1; W_hh1]

    # ---- Hoisted layer-0 input projection: one MXU matmul for all timesteps,
    #      bias folded in.  xf is (T*B, I); xg0 is (T*B, 4H).
    xg0 = (jnp.dot(xf_ref[...], wih0_ref[...],
                   preferred_element_type=jnp.float32)
           + b0_ref[...])

    # ---- Hoist the layer-1 bias broadcast (JAX does not CSE broadcast_in_dim).
    b1 = jnp.broadcast_to(b1_ref[...], (B, 4 * H))

    def gates_to_hc(gates, c):
        # Full-vreg EUP ops, then static lane slices (PyTorch gate order i,f,g,o).
        sig = jax.nn.sigmoid(gates)     # (B, 4H)
        tnh = jnp.tanh(gates)           # (B, 4H)
        i = sig[:, 0 * H:1 * H]
        f = sig[:, 1 * H:2 * H]
        g = tnh[:, 2 * H:3 * H]
        o = sig[:, 3 * H:4 * H]
        c_new = f * c + i * g
        h_new = o * jnp.tanh(c_new)
        return h_new, c_new

    h_l0, c_l0 = h0_ref[0], c0_ref[0]
    h_l1, c_l1 = h0_ref[1], c0_ref[1]

    # ---- Fully unrolled recurrence (T static & small): only the h-dependent
    #      matmuls remain on the serial critical path.
    for t in range(T):
        # layer 0: recurrent matmul + precomputed input projection (bias folded)
        g0 = (jnp.dot(h_l0, whh0, preferred_element_type=jnp.float32)
              + xg0[t * B:(t + 1) * B, :])
        h_l0, c_l0 = gates_to_hc(g0, c_l0)

        # layer 1: single fused matmul over concat([h_l0, h_l1])
        g1 = (jnp.dot(jnp.concatenate([h_l0, h_l1], axis=1), w1,
                      preferred_element_type=jnp.float32)
              + b1)
        h_l1, c_l1 = gates_to_hc(g1, c_l1)

    # fc(out[:, -1, :])  — last-timestep hidden of the top layer
    out_ref[...] = (jnp.dot(h_l1, wfc_ref[...],
                            preferred_element_type=jnp.float32)
                    + bfc_ref[...])

    # Coalesced epilogue: single full-block store of [h_n ; c_n] = (2L, B, H).
    state_ref[...] = jnp.concatenate(
        [h_l0[None], h_l1[None], c_l0[None], c_l1[None]], axis=0)


def music_rnn_forward(x, hidden, params):
    """x: (B, T, I) float32; hidden: (h0, c0) each (L=2, B, H)."""
    h0, c0 = hidden
    B, T, I = x.shape
    L, _, H = h0.shape
    assert L == 2
    O = params["w_fc"].shape[1]

    # Layout plumbing only: batch_first -> time-major, flattened to (T*B, I)
    # so the kernel's hoisted input projection is a single dense matmul.
    x_flat = jnp.transpose(x, (1, 0, 2)).reshape(T * B, I)

    # Fused layer-1 weights: gates1 = concat([h_l0, h_l1]) @ [W_ih1 ; W_hh1].
    w1 = jnp.concatenate([params["w_ih1"], params["w_hh1"]], axis=0)  # (2H, 4H)

    kernel = functools.partial(music_rnn_kernel,
                               hidden_size=H, seq_len=T, batch=B)
    vmem = pl.BlockSpec(memory_space=pltpu.MemorySpace.VMEM)

    out, state = pl.pallas_call(
        kernel,
        out_shape=(
            jax.ShapeDtypeStruct((B, O), jnp.float32),
            jax.ShapeDtypeStruct((2 * L, B, H), jnp.float32),
        ),
        in_specs=[vmem] * 10,
        out_specs=(vmem, vmem),
    )(x_flat, h0, c0,
      params["w_ih0"], params["w_hh0"], params["b0"],
      w1, params["b1"],
      params["w_fc"], params["b_fc"])

    h_n, c_n = state[:L], state[L:]
    return out, (h_n, c_n)


def init_params(key, input_size, hidden_size, output_size):
    """Deterministic PyTorch-style uniform init, weights pre-transposed."""
    H = hidden_size
    ks = jax.random.split(key, 12)
    bound_l = 1.0 / np.sqrt(H)
    u = lambda k, shape, b: jax.random.uniform(k, shape, jnp.float32, -b, b)

    # layer 0: input -> hidden
    w_ih0 = u(ks[0], (input_size, 4 * H), bound_l)      # (I, 4H)  (= W_ih^T)
    w_hh0 = u(ks[1], (H, 4 * H), bound_l)               # (H, 4H)
    b0 = u(ks[2], (1, 4 * H), bound_l) + u(ks[3], (1, 4 * H), bound_l)  # b_ih + b_hh
    # layer 1: hidden -> hidden
    w_ih1 = u(ks[4], (H, 4 * H), bound_l)
    w_hh1 = u(ks[5], (H, 4 * H), bound_l)
    b1 = u(ks[6], (1, 4 * H), bound_l) + u(ks[7], (1, 4 * H), bound_l)
    # fc
    bound_fc = 1.0 / np.sqrt(H)
    w_fc = u(ks[8], (H, output_size), bound_fc)         # (H, O)
    b_fc = u(ks[9], (1, output_size), bound_fc)

    return dict(w_ih0=w_ih0, w_hh0=w_hh0, b0=b0,
                w_ih1=w_ih1, w_hh1=w_hh1, b1=b1,
                w_fc=w_fc, b_fc=b_fc)


def music_rnn_reference(x, hidden, params):
    """Pure-JAX reference replicating torch.nn.LSTM(batch_first) + Linear."""
    h0, c0 = hidden
    B, T, I = x.shape
    H = h0.shape[-1]

    def cell(x_t, h, c, w_ih, w_hh, b):
        gates = x_t @ w_ih + h @ w_hh + b
        i = jax.nn.sigmoid(gates[:, 0 * H:1 * H])
        f = jax.nn.sigmoid(gates[:, 1 * H:2 * H])
        g = jnp.tanh(gates[:, 2 * H:3 * H])
        o = jax.nn.sigmoid(gates[:, 3 * H:4 * H])
        c_new = f * c + i * g
        return o * jnp.tanh(c_new), c_new

    h_l0, c_l0, h_l1, c_l1 = h0[0], c0[0], h0[1], c0[1]
    for t in range(T):
        x_t = x[:, t, :]
        h_l0, c_l0 = cell(x_t, h_l0, c_l0, params["w_ih0"], params["w_hh0"], params["b0"])
        h_l1, c_l1 = cell(h_l0, h_l1, c_l1, params["w_ih1"], params["w_hh1"], params["b1"])
    out = h_l1 @ params["w_fc"] + params["b_fc"]
    h_n = jnp.stack([h_l0, h_l1])
    c_n = jnp.stack([c_l0, c_l1])
    return out, (h_n, c_n)


if __name__ == "__main__":
    B, T = 2, 8
    input_size, hidden_size, output_size, num_layers = 16, 32, 16, 2

    key = jax.random.PRNGKey(0)
    k_x, k_p = jax.random.split(key)

    x = jax.random.normal(k_x, (B, T, input_size), dtype=jnp.float32)
    h0 = jnp.zeros((num_layers, B, hidden_size), jnp.float32)   # init_hidden
    c0 = jnp.zeros((num_layers, B, hidden_size), jnp.float32)
    params = init_params(k_p, input_size, hidden_size, output_size)

    out, (h_n, c_n) = music_rnn_forward(x, (h0, c0), params)
    jax.block_until_ready((out, h_n, c_n))

    out_ref, (h_ref, c_ref) = music_rnn_reference(x, (h0, c0), params)
    np.testing.assert_allclose(np.asarray(out), np.asarray(out_ref), rtol=1e-4, atol=1e-4)
    np.testing.assert_allclose(np.asarray(h_n), np.asarray(h_ref), rtol=1e-4, atol=1e-4)
    np.testing.assert_allclose(np.asarray(c_n), np.asarray(c_ref), rtol=1e-4, atol=1e-4)

    print("KERNEL_OK")
</pallas_src>

<mosaic_0001>
module attributes {stable_mosaic.version = 11 : i64} {
  func.func @music_rnn_kernel(%arg0: memref<16x16xf32, #tpu.memory_space<vmem>>, %arg1: memref<2x2x32xf32, #tpu.memory_space<vmem>>, %arg2: memref<2x2x32xf32, #tpu.memory_space<vmem>>, %arg3: memref<16x128xf32, #tpu.memory_space<vmem>>, %arg4: memref<32x128xf32, #tpu.memory_space<vmem>>, %arg5: memref<1x128xf32, #tpu.memory_space<vmem>>, %arg6: memref<64x128xf32, #tpu.memory_space<vmem>>, %arg7: memref<1x128xf32, #tpu.memory_space<vmem>>, %arg8: memref<32x16xf32, #tpu.memory_space<vmem>>, %arg9: memref<1x16xf32, #tpu.memory_space<vmem>>, %arg10: memref<2x16xf32, #tpu.memory_space<vmem>>, %arg11: memref<4x2x32xf32, #tpu.memory_space<vmem>>) attributes {dimension_semantics = [], scalar_prefetch = 0 : i64, scratch_operands = 0 : i64, tpu.core_type = #tpu.core_type<tc>} {
    %c0 = arith.constant 0 : index
    %c0_0 = arith.constant 0 : index
    %0 = vector.load %arg4[%c0, %c0_0] : memref<32x128xf32, #tpu.memory_space<vmem>>, vector<32x128xf32>
    %c0_1 = arith.constant 0 : index
    %c0_2 = arith.constant 0 : index
    %1 = vector.load %arg6[%c0_1, %c0_2] : memref<64x128xf32, #tpu.memory_space<vmem>>, vector<64x128xf32>
    %c0_3 = arith.constant 0 : index
    %c0_4 = arith.constant 0 : index
    %2 = vector.load %arg0[%c0_3, %c0_4] : memref<16x16xf32, #tpu.memory_space<vmem>>, vector<16x16xf32>
    %c0_5 = arith.constant 0 : index
    %c0_6 = arith.constant 0 : index
    %3 = vector.load %arg3[%c0_5, %c0_6] : memref<16x128xf32, #tpu.memory_space<vmem>>, vector<16x128xf32>
    %cst = arith.constant dense<0.000000e+00> : vector<16x128xf32>
    %4 = tpu.matmul %2, %3, %cst {dimension_numbers = #tpu.dot_dimension_numbers<[1], [0], [0], [1], [0, 0, 1, 1], [], []>} : vector<16x16xf32>, vector<16x128xf32>, vector<16x128xf32> -> vector<16x128xf32>
    %c0_7 = arith.constant 0 : index
    %c0_8 = arith.constant 0 : index
    %5 = vector.load %arg5[%c0_7, %c0_8] : memref<1x128xf32, #tpu.memory_space<vmem>>, vector<1x128xf32>
    %6 = vector.broadcast %5 : vector<1x128xf32> to vector<16x128xf32>
    %7 = arith.addf %4, %6 : vector<16x128xf32>
    %c0_9 = arith.constant 0 : index
    %c0_10 = arith.constant 0 : index
    %8 = vector.load %arg7[%c0_9, %c0_10] : memref<1x128xf32, #tpu.memory_space<vmem>>, vector<1x128xf32>
    %9 = vector.shape_cast %8 : vector<1x128xf32> to vector<1x128xf32>
    %10 = vector.broadcast %9 : vector<1x128xf32> to vector<2x128xf32>
    %c0_11 = arith.constant 0 : index
    %c0_12 = arith.constant 0 : index
    %c0_13 = arith.constant 0 : index
    %11 = vector.load %arg1[%c0_11, %c0_12, %c0_13] : memref<2x2x32xf32, #tpu.memory_space<vmem>>, vector<1x2x32xf32>
    %12 = vector.shape_cast %11 : vector<1x2x32xf32> to vector<2x32xf32>
    %c0_14 = arith.constant 0 : index
    %c0_15 = arith.constant 0 : index
    %c0_16 = arith.constant 0 : index
    %13 = vector.load %arg2[%c0_14, %c0_15, %c0_16] : memref<2x2x32xf32, #tpu.memory_space<vmem>>, vector<1x2x32xf32>
    %14 = vector.shape_cast %13 : vector<1x2x32xf32> to vector<2x32xf32>
    %c1 = arith.constant 1 : index
    %c0_17 = arith.constant 0 : index
    %c0_18 = arith.constant 0 : index
    %15 = vector.load %arg1[%c1, %c0_17, %c0_18] : memref<2x2x32xf32, #tpu.memory_space<vmem>>, vector<1x2x32xf32>
    %16 = vector.shape_cast %15 : vector<1x2x32xf32> to vector<2x32xf32>
    %c1_19 = arith.constant 1 : index
    %c0_20 = arith.constant 0 : index
    %c0_21 = arith.constant 0 : index
    %17 = vector.load %arg2[%c1_19, %c0_20, %c0_21] : memref<2x2x32xf32, #tpu.memory_space<vmem>>, vector<1x2x32xf32>
    %18 = vector.shape_cast %17 : vector<1x2x32xf32> to vector<2x32xf32>
    %cst_22 = arith.constant dense<0.000000e+00> : vector<2x128xf32>
    %19 = tpu.matmul %12, %0, %cst_22 {dimension_numbers = #tpu.dot_dimension_numbers<[1], [0], [0], [1], [0, 0, 1, 1], [], []>} : vector<2x32xf32>, vector<32x128xf32>, vector<2x128xf32> -> vector<2x128xf32>
    %20 = vector.extract_strided_slice %7 {offsets = [0, 0], sizes = [2, 128], strides = [1, 1]} : vector<16x128xf32> to vector<2x128xf32>
    %21 = arith.addf %19, %20 : vector<2x128xf32>
    %22 = arith.negf %21 : vector<2x128xf32>
    %23 = math.exp %22 : vector<2x128xf32>
    %cst_23 = arith.constant 1.000000e+00 : f32
    %24 = vector.broadcast %cst_23 : f32 to vector<2x128xf32>
    %25 = arith.addf %24, %23 : vector<2x128xf32>
    %26 = arith.divf %24, %25 : vector<2x128xf32>
    %27 = math.tanh %21 : vector<2x128xf32>
    %28 = vector.extract_strided_slice %26 {offsets = [0, 0], sizes = [2, 32], strides = [1, 1]} : vector<2x128xf32> to vector<2x32xf32>
    %29 = vector.extract_strided_slice %26 {offsets = [0, 32], sizes = [2, 32], strides = [1, 1]} : vector<2x128xf32> to vector<2x32xf32>
    %30 = vector.extract_strided_slice %27 {offsets = [0, 64], sizes = [2, 32], strides = [1, 1]} : vector<2x128xf32> to vector<2x32xf32>
    %31 = vector.extract_strided_slice %26 {offsets = [0, 96], sizes = [2, 32], strides = [1, 1]} : vector<2x128xf32> to vector<2x32xf32>
    %32 = arith.mulf %29, %14 : vector<2x32xf32>
    %33 = arith.mulf %28, %30 : vector<2x32xf32>
    %34 = arith.addf %32, %33 : vector<2x32xf32>
    %35 = math.tanh %34 : vector<2x32xf32>
    %36 = arith.mulf %31, %35 : vector<2x32xf32>
    %37 = tpu.concatenate %36, %16 in 1 : vector<2x32xf32>, vector<2x32xf32> -> vector<2x64xf32>
    %cst_24 = arith.constant dense<0.000000e+00> : vector<2x128xf32>
    %38 = tpu.matmul %37, %1, %cst_24 {dimension_numbers = #tpu.dot_dimension_numbers<[1], [0], [0], [1], [0, 0, 1, 1], [], []>} : vector<2x64xf32>, vector<64x128xf32>, vector<2x128xf32> -> vector<2x128xf32>
    %39 = arith.addf %38, %10 : vector<2x128xf32>
    %40 = arith.negf %39 : vector<2x128xf32>
    %41 = math.exp %40 : vector<2x128xf32>
    %cst_25 = arith.constant 1.000000e+00 : f32
    %42 = vector.broadcast %cst_25 : f32 to vector<2x128xf32>
    %43 = arith.addf %42, %41 : vector<2x128xf32>
    %44 = arith.divf %42, %43 : vector<2x128xf32>
    %45 = math.tanh %39 : vector<2x128xf32>
    %46 = vector.extract_strided_slice %44 {offsets = [0, 0], sizes = [2, 32], strides = [1, 1]} : vector<2x128xf32> to vector<2x32xf32>
    %47 = vector.extract_strided_slice %44 {offsets = [0, 32], sizes = [2, 32], strides = [1, 1]} : vector<2x128xf32> to vector<2x32xf32>
    %48 = vector.extract_strided_slice %45 {offsets = [0, 64], sizes = [2, 32], strides = [1, 1]} : vector<2x128xf32> to vector<2x32xf32>
    %49 = vector.extract_strided_slice %44 {offsets = [0, 96], sizes = [2, 32], strides = [1, 1]} : vector<2x128xf32> to vector<2x32xf32>
    %50 = arith.mulf %47, %18 : vector<2x32xf32>
    %51 = arith.mulf %46, %48 : vector<2x32xf32>
    %52 = arith.addf %50, %51 : vector<2x32xf32>
    %53 = math.tanh %52 : vector<2x32xf32>
    %54 = arith.mulf %49, %53 : vector<2x32xf32>
    %cst_26 = arith.constant dense<0.000000e+00> : vector<2x128xf32>
    %55 = tpu.matmul %36, %0, %cst_26 {dimension_numbers = #tpu.dot_dimension_numbers<[1], [0], [0], [1], [0, 0, 1, 1], [], []>} : vector<2x32xf32>, vector<32x128xf32>, vector<2x128xf32> -> vector<2x128xf32>
    %56 = vector.extract_strided_slice %7 {offsets = [2, 0], sizes = [2, 128], strides = [1, 1]} : vector<16x128xf32> to vector<2x128xf32>
    %57 = arith.addf %55, %56 : vector<2x128xf32>
    %58 = arith.negf %57 : vector<2x128xf32>
    %59 = math.exp %58 : vector<2x128xf32>
    %cst_27 = arith.constant 1.000000e+00 : f32
    %60 = vector.broadcast %cst_27 : f32 to vector<2x128xf32>
    %61 = arith.addf %60, %59 : vector<2x128xf32>
    %62 = arith.divf %60, %61 : vector<2x128xf32>
    %63 = math.tanh %57 : vector<2x128xf32>
    %64 = vector.extract_strided_slice %62 {offsets = [0, 0], sizes = [2, 32], strides = [1, 1]} : vector<2x128xf32> to vector<2x32xf32>
    %65 = vector.extract_strided_slice %62 {offsets = [0, 32], sizes = [2, 32], strides = [1, 1]} : vector<2x128xf32> to vector<2x32xf32>
    %66 = vector.extract_strided_slice %63 {offsets = [0, 64], sizes = [2, 32], strides = [1, 1]} : vector<2x128xf32> to vector<2x32xf32>
    %67 = vector.extract_strided_slice %62 {offsets = [0, 96], sizes = [2, 32], strides = [1, 1]} : vector<2x128xf32> to vector<2x32xf32>
    %68 = arith.mulf %65, %34 : vector<2x32xf32>
    %69 = arith.mulf %64, %66 : vector<2x32xf32>
    %70 = arith.addf %68, %69 : vector<2x32xf32>
    %71 = math.tanh %70 : vector<2x32xf32>
    %72 = arith.mulf %67, %71 : vector<2x32xf32>
    %73 = tpu.concatenate %72, %54 in 1 : vector<2x32xf32>, vector<2x32xf32> -> vector<2x64xf32>
    %cst_28 = arith.constant dense<0.000000e+00> : vector<2x128xf32>
    %74 = tpu.matmul %73, %1, %cst_28 {dimension_numbers = #tpu.dot_dimension_numbers<[1], [0], [0], [1], [0, 0, 1, 1], [], []>} : vector<2x64xf32>, vector<64x128xf32>, vector<2x128xf32> -> vector<2x128xf32>
    %75 = arith.addf %74, %10 : vector<2x128xf32>
    %76 = arith.negf %75 : vector<2x128xf32>
    %77 = math.exp %76 : vector<2x128xf32>
    %cst_29 = arith.constant 1.000000e+00 : f32
    %78 = vector.broadcast %cst_29 : f32 to vector<2x128xf32>
    %79 = arith.addf %78, %77 : vector<2x128xf32>
    %80 = arith.divf %78, %79 : vector<2x128xf32>
    %81 = math.tanh %75 : vector<2x128xf32>
    %82 = vector.extract_strided_slice %80 {offsets = [0, 0], sizes = [2, 32], strides = [1, 1]} : vector<2x128xf32> to vector<2x32xf32>
    %83 = vector.extract_strided_slice %80 {offsets = [0, 32], sizes = [2, 32], strides = [1, 1]} : vector<2x128xf32> to vector<2x32xf32>
    %84 = vector.extract_strided_slice %81 {offsets = [0, 64], sizes = [2, 32], strides = [1, 1]} : vector<2x128xf32> to vector<2x32xf32>
    %85 = vector.extract_strided_slice %80 {offsets = [0, 96], sizes = [2, 32], strides = [1, 1]} : vector<2x128xf32> to vector<2x32xf32>
    %86 = arith.mulf %83, %52 : vector<2x32xf32>
    %87 = arith.mulf %82, %84 : vector<2x32xf32>
    %88 = arith.addf %86, %87 : vector<2x32xf32>
    %89 = math.tanh %88 : vector<2x32xf32>
    %90 = arith.mulf %85, %89 : vector<2x32xf32>
    %cst_30 = arith.constant dense<0.000000e+00> : vector<2x128xf32>
    %91 = tpu.matmul %72, %0, %cst_30 {dimension_numbers = #tpu.dot_dimension_numbers<[1], [0], [0], [1], [0, 0, 1, 1], [], []>} : vector<2x32xf32>, vector<32x128xf32>, vector<2x128xf32> -> vector<2x128xf32>
    %92 = vector.extract_strided_slice %7 {offsets = [4, 0], sizes = [2, 128], strides = [1, 1]} : vector<16x128xf32> to vector<2x128xf32>
    %93 = arith.addf %91, %92 : vector<2x128xf32>
    %94 = arith.negf %93 : vector<2x128xf32>
    %95 = math.exp %94 : vector<2x128xf32>
    %cst_31 = arith.constant 1.000000e+00 : f32
    %96 = vector.broadcast %cst_31 : f32 to vector<2x128xf32>
    %97 = arith.addf %96, %95 : vector<2x128xf32>
    %98 = arith.divf %96, %97 : vector<2x128xf32>
    %99 = math.tanh %93 : vector<2x128xf32>
    %100 = vector.extract_strided_slice %98 {offsets = [0, 0], sizes = [2, 32], strides = [1, 1]} : vector<2x128xf32> to vector<2x32xf32>
    %101 = vector.extract_strided_slice %98 {offsets = [0, 32], sizes = [2, 32], strides = [1, 1]} : vector<2x128xf32> to vector<2x32xf32>
    %102 = vector.extract_strided_slice %99 {offsets = [0, 64], sizes = [2, 32], strides = [1, 1]} : vector<2x128xf32> to vector<2x32xf32>
    %103 = vector.extract_strided_slice %98 {offsets = [0, 96], sizes = [2, 32], strides = [1, 1]} : vector<2x128xf32> to vector<2x32xf32>
    %104 = arith.mulf %101, %70 : vector<2x32xf32>
    %105 = arith.mulf %100, %102 : vector<2x32xf32>
    %106 = arith.addf %104, %105 : vector<2x32xf32>
    %107 = math.tanh %106 : vector<2x32xf32>
    %108 = arith.mulf %103, %107 : vector<2x32xf32>
    %109 = tpu.concatenate %108, %90 in 1 : vector<2x32xf32>, vector<2x32xf32> -> vector<2x64xf32>
    %cst_32 = arith.constant dense<0.000000e+00> : vector<2x128xf32>
    %110 = tpu.matmul %109, %1, %cst_32 {dimension_numbers = #tpu.dot_dimension_numbers<[1], [0], [0], [1], [0, 0, 1, 1], [], []>} : vector<2x64xf32>, vector<64x128xf32>, vector<2x128xf32> -> vector<2x128xf32>
    %111 = arith.addf %110, %10 : vector<2x128xf32>
    %112 = arith.negf %111 : vector<2x128xf32>
    %113 = math.exp %112 : vector<2x128xf32>
    %cst_33 = arith.constant 1.000000e+00 : f32
    %114 = vector.broadcast %cst_33 : f32 to vector<2x128xf32>
    %115 = arith.addf %114, %113 : vector<2x128xf32>
    %116 = arith.divf %114, %115 : vector<2x128xf32>
    %117 = math.tanh %111 : vector<2x128xf32>
    %118 = vector.extract_strided_slice %116 {offsets = [0, 0], sizes = [2, 32], strides = [1, 1]} : vector<2x128xf32> to vector<2x32xf32>
    %119 = vector.extract_strided_slice %116 {offsets = [0, 32], sizes = [2, 32], strides = [1, 1]} : vector<2x128xf32> to vector<2x32xf32>
    %120 = vector.extract_strided_slice %117 {offsets = [0, 64], sizes = [2, 32], strides = [1, 1]} : vector<2x128xf32> to vector<2x32xf32>
    %121 = vector.extract_strided_slice %116 {offsets = [0, 96], sizes = [2, 32], strides = [1, 1]} : vector<2x128xf32> to vector<2x32xf32>
    %122 = arith.mulf %119, %88 : vector<2x32xf32>
    %123 = arith.mulf %118, %120 : vector<2x32xf32>
    %124 = arith.addf %122, %123 : vector<2x32xf32>
    %125 = math.tanh %124 : vector<2x32xf32>
    %126 = arith.mulf %121, %125 : vector<2x32xf32>
    %cst_34 = arith.constant dense<0.000000e+00> : vector<2x128xf32>
    %127 = tpu.matmul %108, %0, %cst_34 {dimension_numbers = #tpu.dot_dimension_numbers<[1], [0], [0], [1], [0, 0, 1, 1], [], []>} : vector<2x32xf32>, vector<32x128xf32>, vector<2x128xf32> -> vector<2x128xf32>
    %128 = vector.extract_strided_slice %7 {offsets = [6, 0], sizes = [2, 128], strides = [1, 1]} : vector<16x128xf32> to vector<2x128xf32>
    %129 = arith.addf %127, %128 : vector<2x128xf32>
    %130 = arith.negf %129 : vector<2x128xf32>
    %131 = math.exp %130 : vector<2x128xf32>
    %cst_35 = arith.constant 1.000000e+00 : f32
    %132 = vector.broadcast %cst_35 : f32 to vector<2x128xf32>
    %133 = arith.addf %132, %131 : vector<2x128xf32>
    %134 = arith.divf %132, %133 : vector<2x128xf32>
    %135 = math.tanh %129 : vector<2x128xf32>
    %136 = vector.extract_strided_slice %134 {offsets = [0, 0], sizes = [2, 32], strides = [1, 1]} : vector<2x128xf32> to vector<2x32xf32>
    %137 = vector.extract_strided_slice %134 {offsets = [0, 32], sizes = [2, 32], strides = [1, 1]} : vector<2x128xf32> to vector<2x32xf32>
    %138 = vector.extract_strided_slice %135 {offsets = [0, 64], sizes = [2, 32], strides = [1, 1]} : vector<2x128xf32> to vector<2x32xf32>
    %139 = vector.extract_strided_slice %134 {offsets = [0, 96], sizes = [2, 32], strides = [1, 1]} : vector<2x128xf32> to vector<2x32xf32>
    %140 = arith.mulf %137, %106 : vector<2x32xf32>
    %141 = arith.mulf %136, %138 : vector<2x32xf32>
    %142 = arith.addf %140, %141 : vector<2x32xf32>
    %143 = math.tanh %142 : vector<2x32xf32>
    %144 = arith.mulf %139, %143 : vector<2x32xf32>
    %145 = tpu.concatenate %144, %126 in 1 : vector<2x32xf32>, vector<2x32xf32> -> vector<2x64xf32>
    %cst_36 = arith.constant dense<0.000000e+00> : vector<2x128xf32>
    %146 = tpu.matmul %145, %1, %cst_36 {dimension_numbers = #tpu.dot_dimension_numbers<[1], [0], [0], [1], [0, 0, 1, 1], [], []>} : vector<2x64xf32>, vector<64x128xf32>, vector<2x128xf32> -> vector<2x128xf32>
    %147 = arith.addf %146, %10 : vector<2x128xf32>
    %148 = arith.negf %147 : vector<2x128xf32>
    %149 = math.exp %148 : vector<2x128xf32>
    %cst_37 = arith.constant 1.000000e+00 : f32
    %150 = vector.broadcast %cst_37 : f32 to vector<2x128xf32>
    %151 = arith.addf %150, %149 : vector<2x128xf32>
    %152 = arith.divf %150, %151 : vector<2x128xf32>
    %153 = math.tanh %147 : vector<2x128xf32>
    %154 = vector.extract_strided_slice %152 {offsets = [0, 0], sizes = [2, 32], strides = [1, 1]} : vector<2x128xf32> to vector<2x32xf32>
    %155 = vector.extract_strided_slice %152 {offsets = [0, 32], sizes = [2, 32], strides = [1, 1]} : vector<2x128xf32> to vector<2x32xf32>
    %156 = vector.extract_strided_slice %153 {offsets = [0, 64], sizes = [2, 32], strides = [1, 1]} : vector<2x128xf32> to vector<2x32xf32>
    %157 = vector.extract_strided_slice %152 {offsets = [0, 96], sizes = [2, 32], strides = [1, 1]} : vector<2x128xf32> to vector<2x32xf32>
    %158 = arith.mulf %155, %124 : vector<2x32xf32>
    %159 = arith.mulf %154, %156 : vector<2x32xf32>
    %160 = arith.addf %158, %159 : vector<2x32xf32>
    %161 = math.tanh %160 : vector<2x32xf32>
    %162 = arith.mulf %157, %161 : vector<2x32xf32>
    %cst_38 = arith.constant dense<0.000000e+00> : vector<2x128xf32>
    %163 = tpu.matmul %144, %0, %cst_38 {dimension_numbers = #tpu.dot_dimension_numbers<[1], [0], [0], [1], [0, 0, 1, 1], [], []>} : vector<2x32xf32>, vector<32x128xf32>, vector<2x128xf32> -> vector<2x128xf32>
    %164 = vector.extract_strided_slice %7 {offsets = [8, 0], sizes = [2, 128], strides = [1, 1]} : vector<16x128xf32> to vector<2x128xf32>
    %165 = arith.addf %163, %164 : vector<2x128xf32>
    %166 = arith.negf %165 : vector<2x128xf32>
    %167 = math.exp %166 : vector<2x128xf32>
    %cst_39 = arith.constant 1.000000e+00 : f32
    %168 = vector.broadcast %cst_39 : f32 to vector<2x128xf32>
    %169 = arith.addf %168, %167 : vector<2x128xf32>
    %170 = arith.divf %168, %169 : vector<2x128xf32>
    %171 = math.tanh %165 : vector<2x128xf32>
    %172 = vector.extract_strided_slice %170 {offsets = [0, 0], sizes = [2, 32], strides = [1, 1]} : vector<2x128xf32> to vector<2x32xf32>
    %173 = vector.extract_strided_slice %170 {offsets = [0, 32], sizes = [2, 32], strides = [1, 1]} : vector<2x128xf32> to vector<2x32xf32>
    %174 = vector.extract_strided_slice %171 {offsets = [0, 64], sizes = [2, 32], strides = [1, 1]} : vector<2x128xf32> to vector<2x32xf32>
    %175 = vector.extract_strided_slice %170 {offsets = [0, 96], sizes = [2, 32], strides = [1, 1]} : vector<2x128xf32> to vector<2x32xf32>
    %176 = arith.mulf %173, %142 : vector<2x32xf32>
    %177 = arith.mulf %172, %174 : vector<2x32xf32>
    %178 = arith.addf %176, %177 : vector<2x32xf32>
    %179 = math.tanh %178 : vector<2x32xf32>
    %180 = arith.mulf %175, %179 : vector<2x32xf32>
    %181 = tpu.concatenate %180, %162 in 1 : vector<2x32xf32>, vector<2x32xf32> -> vector<2x64xf32>
    %cst_40 = arith.constant dense<0.000000e+00> : vector<2x128xf32>
    %182 = tpu.matmul %181, %1, %cst_40 {dimension_numbers = #tpu.dot_dimension_numbers<[1], [0], [0], [1], [0, 0, 1, 1], [], []>} : vector<2x64xf32>, vector<64x128xf32>, vector<2x128xf32> -> vector<2x128xf32>
    %183 = arith.addf %182, %10 : vector<2x128xf32>
    %184 = arith.negf %183 : vector<2x128xf32>
    %185 = math.exp %184 : vector<2x128xf32>
    %cst_41 = arith.constant 1.000000e+00 : f32
    %186 = vector.broadcast %cst_41 : f32 to vector<2x128xf32>
    %187 = arith.addf %186, %185 : vector<2x128xf32>
    %188 = arith.divf %186, %187 : vector<2x128xf32>
    %189 = math.tanh %183 : vector<2x128xf32>
    %190 = vector.extract_strided_slice %188 {offsets = [0, 0], sizes = [2, 32], strides = [1, 1]} : vector<2x128xf32> to vector<2x32xf32>
    %191 = vector.extract_strided_slice %188 {offsets = [0, 32], sizes = [2, 32], strides = [1, 1]} : vector<2x128xf32> to vector<2x32xf32>
    %192 = vector.extract_strided_slice %189 {offsets = [0, 64], sizes = [2, 32], strides = [1, 1]} : vector<2x128xf32> to vector<2x32xf32>
    %193 = vector.extract_strided_slice %188 {offsets = [0, 96], sizes = [2, 32], strides = [1, 1]} : vector<2x128xf32> to vector<2x32xf32>
    %194 = arith.mulf %191, %160 : vector<2x32xf32>
    %195 = arith.mulf %190, %192 : vector<2x32xf32>
    %196 = arith.addf %194, %195 : vector<2x32xf32>
    %197 = math.tanh %196 : vector<2x32xf32>
    %198 = arith.mulf %193, %197 : vector<2x32xf32>
    %cst_42 = arith.constant dense<0.000000e+00> : vector<2x128xf32>
    %199 = tpu.matmul %180, %0, %cst_42 {dimension_numbers = #tpu.dot_dimension_numbers<[1], [0], [0], [1], [0, 0, 1, 1], [], []>} : vector<2x32xf32>, vector<32x128xf32>, vector<2x128xf32> -> vector<2x128xf32>
    %200 = vector.extract_strided_slice %7 {offsets = [10, 0], sizes = [2, 128], strides = [1, 1]} : vector<16x128xf32> to vector<2x128xf32>
    %201 = arith.addf %199, %200 : vector<2x128xf32>
    %202 = arith.negf %201 : vector<2x128xf32>
    %203 = math.exp %202 : vector<2x128xf32>
    %cst_43 = arith.constant 1.000000e+00 : f32
    %204 = vector.broadcast %cst_43 : f32 to vector<2x128xf32>
    %205 = arith.addf %204, %203 : vector<2x128xf32>
    %206 = arith.divf %204, %205 : vector<2x128xf32>
    %207 = math.tanh %201 : vector<2x128xf32>
    %208 = vector.extract_strided_slice %206 {offsets = [0, 0], sizes = [2, 32], strides = [1, 1]} : vector<2x128xf32> to vector<2x32xf32>
    %209 = vector.extract_strided_slice %206 {offsets = [0, 32], sizes = [2, 32], strides = [1, 1]} : vector<2x128xf32> to vector<2x32xf32>
    %210 = vector.extract_strided_slice %207 {offsets = [0, 64], sizes = [2, 32], strides = [1, 1]} : vector<2x128xf32> to vector<2x32xf32>
    %211 = vector.extract_strided_slice %206 {offsets = [0, 96], sizes = [2, 32], strides = [1, 1]} : vector<2x128xf32> to vector<2x32xf32>
    %212 = arith.mulf %209, %178 : vector<2x32xf32>
    %213 = arith.mulf %208, %210 : vector<2x32xf32>
    %214 = arith.addf %212, %213 : vector<2x32xf32>
    %215 = math.tanh %214 : vector<2x32xf32>
    %216 = arith.mulf %211, %215 : vector<2x32xf32>
    %217 = tpu.concatenate %216, %198 in 1 : vector<2x32xf32>, vector<2x32xf32> -> vector<2x64xf32>
    %cst_44 = arith.constant dense<0.000000e+00> : vector<2x128xf32>
    %218 = tpu.matmul %217, %1, %cst_44 {dimension_numbers = #tpu.dot_dimension_numbers<[1], [0], [0], [1], [0, 0, 1, 1], [], []>} : vector<2x64xf32>, vector<64x128xf32>, vector<2x128xf32> -> vector<2x128xf32>
    %219 = arith.addf %218, %10 : vector<2x128xf32>
    %220 = arith.negf %219 : vector<2x128xf32>
    %221 = math.exp %220 : vector<2x128xf32>
    %cst_45 = arith.constant 1.000000e+00 : f32
    %222 = vector.broadcast %cst_45 : f32 to vector<2x128xf32>
    %223 = arith.addf %222, %221 : vector<2x128xf32>
    %224 = arith.divf %222, %223 : vector<2x128xf32>
    %225 = math.tanh %219 : vector<2x128xf32>
    %226 = vector.extract_strided_slice %224 {offsets = [0, 0], sizes = [2, 32], strides = [1, 1]} : vector<2x128xf32> to vector<2x32xf32>
    %227 = vector.extract_strided_slice %224 {offsets = [0, 32], sizes = [2, 32], strides = [1, 1]} : vector<2x128xf32> to vector<2x32xf32>
    %228 = vector.extract_strided_slice %225 {offsets = [0, 64], sizes = [2, 32], strides = [1, 1]} : vector<2x128xf32> to vector<2x32xf32>
    %229 = vector.extract_strided_slice %224 {offsets = [0, 96], sizes = [2, 32], strides = [1, 1]} : vector<2x128xf32> to vector<2x32xf32>
    %230 = arith.mulf %227, %196 : vector<2x32xf32>
    %231 = arith.mulf %226, %228 : vector<2x32xf32>
    %232 = arith.addf %230, %231 : vector<2x32xf32>
    %233 = math.tanh %232 : vector<2x32xf32>
    %234 = arith.mulf %229, %233 : vector<2x32xf32>
    %cst_46 = arith.constant dense<0.000000e+00> : vector<2x128xf32>
    %235 = tpu.matmul %216, %0, %cst_46 {dimension_numbers = #tpu.dot_dimension_numbers<[1], [0], [0], [1], [0, 0, 1, 1], [], []>} : vector<2x32xf32>, vector<32x128xf32>, vector<2x128xf32> -> vector<2x128xf32>
    %236 = vector.extract_strided_slice %7 {offsets = [12, 0], sizes = [2, 128], strides = [1, 1]} : vector<16x128xf32> to vector<2x128xf32>
    %237 = arith.addf %235, %236 : vector<2x128xf32>
    %238 = arith.negf %237 : vector<2x128xf32>
    %239 = math.exp %238 : vector<2x128xf32>
    %cst_47 = arith.constant 1.000000e+00 : f32
    %240 = vector.broadcast %cst_47 : f32 to vector<2x128xf32>
    %241 = arith.addf %240, %239 : vector<2x128xf32>
    %242 = arith.divf %240, %241 : vector<2x128xf32>
    %243 = math.tanh %237 : vector<2x128xf32>
    %244 = vector.extract_strided_slice %242 {offsets = [0, 0], sizes = [2, 32], strides = [1, 1]} : vector<2x128xf32> to vector<2x32xf32>
    %245 = vector.extract_strided_slice %242 {offsets = [0, 32], sizes = [2, 32], strides = [1, 1]} : vector<2x128xf32> to vector<2x32xf32>
    %246 = vector.extract_strided_slice %243 {offsets = [0, 64], sizes = [2, 32], strides = [1, 1]} : vector<2x128xf32> to vector<2x32xf32>
    %247 = vector.extract_strided_slice %242 {offsets = [0, 96], sizes = [2, 32], strides = [1, 1]} : vector<2x128xf32> to vector<2x32xf32>
    %248 = arith.mulf %245, %214 : vector<2x32xf32>
    %249 = arith.mulf %244, %246 : vector<2x32xf32>
    %250 = arith.addf %248, %249 : vector<2x32xf32>
    %251 = math.tanh %250 : vector<2x32xf32>
    %252 = arith.mulf %247, %251 : vector<2x32xf32>
    %253 = tpu.concatenate %252, %234 in 1 : vector<2x32xf32>, vector<2x32xf32> -> vector<2x64xf32>
    %cst_48 = arith.constant dense<0.000000e+00> : vector<2x128xf32>
    %254 = tpu.matmul %253, %1, %cst_48 {dimension_numbers = #tpu.dot_dimension_numbers<[1], [0], [0], [1], [0, 0, 1, 1], [], []>} : vector<2x64xf32>, vector<64x128xf32>, vector<2x128xf32> -> vector<2x128xf32>
    %255 = arith.addf %254, %10 : vector<2x128xf32>
    %256 = arith.negf %255 : vector<2x128xf32>
    %257 = math.exp %256 : vector<2x128xf32>
    %cst_49 = arith.constant 1.000000e+00 : f32
    %258 = vector.broadcast %cst_49 : f32 to vector<2x128xf32>
    %259 = arith.addf %258, %257 : vector<2x128xf32>
    %260 = arith.divf %258, %259 : vector<2x128xf32>
    %261 = math.tanh %255 : vector<2x128xf32>
    %262 = vector.extract_strided_slice %260 {offsets = [0, 0], sizes = [2, 32], strides = [1, 1]} : vector<2x128xf32> to vector<2x32xf32>
    %263 = vector.extract_strided_slice %260 {offsets = [0, 32], sizes = [2, 32], strides = [1, 1]} : vector<2x128xf32> to vector<2x32xf32>
    %264 = vector.extract_strided_slice %261 {offsets = [0, 64], sizes = [2, 32], strides = [1, 1]} : vector<2x128xf32> to vector<2x32xf32>
    %265 = vector.extract_strided_slice %260 {offsets = [0, 96], sizes = [2, 32], strides = [1, 1]} : vector<2x128xf32> to vector<2x32xf32>
    %266 = arith.mulf %263, %232 : vector<2x32xf32>
    %267 = arith.mulf %262, %264 : vector<2x32xf32>
    %268 = arith.addf %266, %267 : vector<2x32xf32>
    %269 = math.tanh %268 : vector<2x32xf32>
    %270 = arith.mulf %265, %269 : vector<2x32xf32>
    %cst_50 = arith.constant dense<0.000000e+00> : vector<2x128xf32>
    %271 = tpu.matmul %252, %0, %cst_50 {dimension_numbers = #tpu.dot_dimension_numbers<[1], [0], [0], [1], [0, 0, 1, 1], [], []>} : vector<2x32xf32>, vector<32x128xf32>, vector<2x128xf32> -> vector<2x128xf32>
    %272 = vector.extract_strided_slice %7 {offsets = [14, 0], sizes = [2, 128], strides = [1, 1]} : vector<16x128xf32> to vector<2x128xf32>
    %273 = arith.addf %271, %272 : vector<2x128xf32>
    %274 = arith.negf %273 : vector<2x128xf32>
    %275 = math.exp %274 : vector<2x128xf32>
    %cst_51 = arith.constant 1.000000e+00 : f32
    %276 = vector.broadcast %cst_51 : f32 to vector<2x128xf32>
    %277 = arith.addf %276, %275 : vector<2x128xf32>
    %278 = arith.divf %276, %277 : vector<2x128xf32>
    %279 = math.tanh %273 : vector<2x128xf32>
    %280 = vector.extract_strided_slice %278 {offsets = [0, 0], sizes = [2, 32], strides = [1, 1]} : vector<2x128xf32> to vector<2x32xf32>
    %281 = vector.extract_strided_slice %278 {offsets = [0, 32], sizes = [2, 32], strides = [1, 1]} : vector<2x128xf32> to vector<2x32xf32>
    %282 = vector.extract_strided_slice %279 {offsets = [0, 64], sizes = [2, 32], strides = [1, 1]} : vector<2x128xf32> to vector<2x32xf32>
    %283 = vector.extract_strided_slice %278 {offsets = [0, 96], sizes = [2, 32], strides = [1, 1]} : vector<2x128xf32> to vector<2x32xf32>
    %284 = arith.mulf %281, %250 : vector<2x32xf32>
    %285 = arith.mulf %280, %282 : vector<2x32xf32>
    %286 = arith.addf %284, %285 : vector<2x32xf32>
    %287 = math.tanh %286 : vector<2x32xf32>
    %288 = arith.mulf %283, %287 : vector<2x32xf32>
    %289 = tpu.concatenate %288, %270 in 1 : vector<2x32xf32>, vector<2x32xf32> -> vector<2x64xf32>
    %cst_52 = arith.constant dense<0.000000e+00> : vector<2x128xf32>
    %290 = tpu.matmul %289, %1, %cst_52 {dimension_numbers = #tpu.dot_dimension_numbers<[1], [0], [0], [1], [0, 0, 1, 1], [], []>} : vector<2x64xf32>, vector<64x128xf32>, vector<2x128xf32> -> vector<2x128xf32>
    %291 = arith.addf %290, %10 : vector<2x128xf32>
    %292 = arith.negf %291 : vector<2x128xf32>
    %293 = math.exp %292 : vector<2x128xf32>
    %cst_53 = arith.constant 1.000000e+00 : f32
    %294 = vector.broadcast %cst_53 : f32 to vector<2x128xf32>
    %295 = arith.addf %294, %293 : vector<2x128xf32>
    %296 = arith.divf %294, %295 : vector<2x128xf32>
    %297 = math.tanh %291 : vector<2x128xf32>
    %298 = vector.extract_strided_slice %296 {offsets = [0, 0], sizes = [2, 32], strides = [1, 1]} : vector<2x128xf32> to vector<2x32xf32>
    %299 = vector.extract_strided_slice %296 {offsets = [0, 32], sizes = [2, 32], strides = [1, 1]} : vector<2x128xf32> to vector<2x32xf32>
    %300 = vector.extract_strided_slice %297 {offsets = [0, 64], sizes = [2, 32], strides = [1, 1]} : vector<2x128xf32> to vector<2x32xf32>
    %301 = vector.extract_strided_slice %296 {offsets = [0, 96], sizes = [2, 32], strides = [1, 1]} : vector<2x128xf32> to vector<2x32xf32>
    %302 = arith.mulf %299, %268 : vector<2x32xf32>
    %303 = arith.mulf %298, %300 : vector<2x32xf32>
    %304 = arith.addf %302, %303 : vector<2x32xf32>
    %305 = math.tanh %304 : vector<2x32xf32>
    %306 = arith.mulf %301, %305 : vector<2x32xf32>
    %c0_54 = arith.constant 0 : index
    %c0_55 = arith.constant 0 : index
    %307 = vector.load %arg8[%c0_54, %c0_55] : memref<32x16xf32, #tpu.memory_space<vmem>>, vector<32x16xf32>
    %cst_56 = arith.constant dense<0.000000e+00> : vector<2x16xf32>
    %308 = tpu.matmul %306, %307, %cst_56 {dimension_numbers = #tpu.dot_dimension_numbers<[1], [0], [0], [1], [0, 0, 1, 1], [], []>} : vector<2x32xf32>, vector<32x16xf32>, vector<2x16xf32> -> vector<2x16xf32>
    %c0_57 = arith.constant 0 : index
    %c0_58 = arith.constant 0 : index
    %309 = vector.load %arg9[%c0_57, %c0_58] : memref<1x16xf32, #tpu.memory_space<vmem>>, vector<1x16xf32>
    %310 = vector.broadcast %309 : vector<1x16xf32> to vector<2x16xf32>
    %311 = arith.addf %308, %310 : vector<2x16xf32>
    %c0_59 = arith.constant 0 : index
    %c0_60 = arith.constant 0 : index
    %312 = vector.load %arg10[%c0_59, %c0_60] : memref<2x16xf32, #tpu.memory_space<vmem>>, vector<2x16xf32>
    tpu.vector_store %arg10[%c0_59, %c0_60], %311 {strides = array<i32>} : memref<2x16xf32, #tpu.memory_space<vmem>>, vector<2x16xf32>,
    %313 = vector.shape_cast %288 : vector<2x32xf32> to vector<1x2x32xf32>
    %314 = vector.shape_cast %306 : vector<2x32xf32> to vector<1x2x32xf32>
    %315 = vector.shape_cast %286 : vector<2x32xf32> to vector<1x2x32xf32>
    %316 = vector.shape_cast %304 : vector<2x32xf32> to vector<1x2x32xf32>
    %317 = tpu.concatenate %313, %314, %315, %316 in 0 : vector<1x2x32xf32>, vector<1x2x32xf32>, vector<1x2x32xf32>, vector<1x2x32xf32> -> vector<4x2x32xf32>
    %c0_61 = arith.constant 0 : index
    %c0_62 = arith.constant 0 : index
    %c0_63 = arith.constant 0 : index
    %318 = vector.load %arg11[%c0_61, %c0_62, %c0_63] : memref<4x2x32xf32, #tpu.memory_space<vmem>>, vector<4x2x32xf32>
    tpu.vector_store %arg11[%c0_61, %c0_62, %c0_63], %317 {strides = array<i32>} : memref<4x2x32xf32, #tpu.memory_space<vmem>>, vector<4x2x32xf32>,
    return
  }
}

</mosaic_0001>

<bundles_post_ra>
// kernel: tpu_custom_call.1
= control target key start
LH: loop header
LB: loop body
LE: loop exit
PB: predicated region body
PF: predicated region fallthrough
CT: control target
= control target key end

     0   :  { %17 = vsyncpa [#allocation3], 0  ;;  %s3379_s0 = inlined_call_operand.hbm [shape: f32[16,16], index: 0, kind: input, shape index: {}]   ;;  %s3380_s1 = inlined_call_operand.vmem [shape: f32[2,2,32], index: 1, kind: input, shape index: {}]   ;;  %s3381_s2 = inlined_call_operand.hbm [shape: f32[2,2,32], index: 2, kind: input, shape index: {}]   ;;  %s3382_s3 = inlined_call_operand.hbm [shape: f32[16,128], index: 3, kind: input, shape index: {}]   ;;  %s3383_s4 = inlined_call_operand.hbm [shape: f32[32,128], index: 4, kind: input, shape index: {}]   ;;  %s3384_s5 = inlined_call_operand.vmem [shape: f32[1,128], index: 5, kind: input, shape index: {}]   ;;  %s3385_s6 = inlined_call_operand.vmem [shape: f32[64,128], index: 6, kind: input, shape index: {}]   ;;  %s3386_s7 = inlined_call_operand.vmem [shape: f32[1,128], index: 7, kind: input, shape index: {}]   ;;  %s3387_s8 = inlined_call_operand.vmem [shape: f32[32,16], index: 8, kind: input, shape index: {}]   ;;  %s3388_s9 = inlined_call_operand.vmem [shape: f32[1,16], index: 9, kind: input, shape index: {}]   ;;  %s3389_s10 = inlined_call_operand.hbm [shape: f32[2,16], index: 10, kind: output, shape index: {0}]   ;;  %s3390_s11 = inlined_call_operand.hbm [shape: f32[4,2,32], index: 11, kind: output, shape index: {1}]  }
   0x1   :  { %18 = vsyncpa [#allocation6], 0 }
   0x2   :  { %19 = vsyncpa [#allocation9], 0 }
   0x3   :  { %20 = vsyncpa [#allocation4], 0 }
   0x4   :  { %21 = vsyncpa [#allocation12], 0  ;;  %s2848_s17 = smov [#allocation5]   ;;  %s2706_s21 = scalar_lea.hbm %s3381_s2, 64 }
   0x5   :  { %s41_s18 = sshll.u32 %s2848_s17, 4  ;;  %p2707_p0 = scmp.ne.s32.totalorder %s3381_s2, %s2706_s21  ;;  %s42_s18 = int_to_ptr.vmem [resolvable:$true] %s41_s18 }
   0x6   :  { %p2710_p1 = scmp.lt.u32.totalorder %s2706_s21, %s3381_s2 }
   0x8   :  { %p2712_p2 = pnand %p2710_p1, %p2707_p0 }
   0xa   :  { %2715 = shalt.err (!%p2712_p2)
}
   0xb   :  { %s2716_s26 = scalar_lea.vmem %s42_s18, 64  ;;  %p2721_p4 = scmp.lt.s32.totalorder %s42_s18, %s42_s18 }
   0xc   :  { %p2717_p3 = scmp.ne.s32.totalorder %s42_s18, %s2716_s26  ;;  %p2722_p5 = scmp.lt.s32.totalorder %s2716_s26, %s2716_s26 }
   0xe   :  { %p2723_p6 = por %p2722_p5, %p2721_p4 }
  0x10   :  { %p2724_p7 = pnand %p2723_p6, %p2717_p3 }
  0x12   :  { %2727 = shalt.err (!%p2724_p7)
}
  0x13   :  { %s2849_s27 = smov 32   ;;  %s2850_s28 = smov 2  }
  0x14   :  { %47 = dma.hbm_to_vmem [thread:$0]  %s3381_s2, 64, %s42_s18, [#allocation6], %s2849_s27, %s2849_s27, %s2850_s28  }
  0x15   :  { %s2851_s12 = smov [#allocation2]   ;;  %s2728_s16 = scalar_lea.hbm %s3379_s0, 256 }
  0x16   :  { %s27_s13 = sshll.u32 %s2851_s12, 4  ;;  %p2729_p8 = scmp.ne.s32.totalorder %s3379_s0, %s2728_s16  ;;  %s28_s13 = int_to_ptr.vmem [resolvable:$true] %s27_s13 }
  0x17   :  { %p2732_p9 = scmp.lt.u32.totalorder %s2728_s16, %s3379_s0 }
  0x19   :  { %p2734_p10 = pnand %p2732_p9, %p2729_p8 }
  0x1b   :  { %2737 = shalt.err (!%p2734_p10)
}
  0x1c   :  { %s2738_s22 = scalar_lea.vmem %s28_s13, 256  ;;  %p2743_p12 = scmp.lt.s32.totalorder %s28_s13, %s28_s13 }
  0x1d   :  { %p2739_p11 = scmp.ne.s32.totalorder %s28_s13, %s2738_s22  ;;  %p2744_p13 = scmp.lt.s32.totalorder %s2738_s22, %s2738_s22 }
  0x1f   :  { %p2745_p0 = por %p2744_p13, %p2743_p12 }
  0x21   :  { %p2746_p1 = pnand %p2745_p0, %p2739_p11 }
  0x23   :  { %2749 = shalt.err (!%p2746_p1)
}
  0x24   :  { %s2852_s2 = smov 128   ;;  %s2853_s18 = smov 8  }
  0x25   :  { %33 = dma.hbm_to_vmem [thread:$0]  %s3379_s0, 256, %s28_s13, [#allocation3], %s2852_s2, %s2852_s2, %s2853_s18  }
  0x26   :  { %s2854_s25 = smov [#allocation7]   ;;  %s2855_s29 = smov [#allocation8]  }
  0x27   :  { %s53_s26 = sshll.u32 %s2854_s25, 4  ;;  %s65_s30 = sshll.u32 %s2855_s29, 4  ;;  %s54_s26 = int_to_ptr.vmem [resolvable:$true] %s53_s26  ;;  %s2952_s30 = int_to_ptr.vmem [resolvable:$true] %s65_s30 }
  0x28   :  { %s2750_s15 = scalar_lea.hbm %s3382_s3, 256 }
  0x29   :  { %p2751_p2 = scmp.ne.s32.totalorder %s3382_s3, %s2750_s15  ;;  %p2754_p3 = scmp.lt.u32.totalorder %s2750_s15, %s3382_s3 }
  0x2b   :  { %p2756_p4 = pnand %p2754_p3, %p2751_p2 }
  0x2d   :  { %2759 = shalt.err (!%p2756_p4)
}
  0x2e   :  { %s2760_s0 = scalar_lea.vmem %s54_s26, 256  ;;  %p2765_p6 = scmp.lt.s32.totalorder %s54_s26, %s54_s26 }
  0x2f   :  { %p2761_p5 = scmp.ne.s32.totalorder %s54_s26, %s2760_s0  ;;  %p2766_p7 = scmp.lt.s32.totalorder %s2760_s0, %s2760_s0 }
  0x31   :  { %p2767_p8 = por %p2766_p7, %p2765_p6 }
  0x33   :  { %p2768_p9 = pnand %p2767_p8, %p2761_p5 }
  0x35   :  { %2771 = shalt.err (!%p2768_p9)
}
  0x36   :  { %59 = dma.hbm_to_vmem [thread:$0]  %s3382_s3, 256, %s54_s26, [#allocation6], %s2852_s2, %s2852_s2, %s2853_s18  }
  0x37   :  { %s2772_s24 = scalar_lea.hbm %s3383_s4, 512 }
  0x38   :  { %p2773_p10 = scmp.ne.s32.totalorder %s3383_s4, %s2772_s24  ;;  %p2776_p11 = scmp.lt.u32.totalorder %s2772_s24, %s3383_s4 }
  0x3a   :  { %p2778_p12 = pnand %p2776_p11, %p2773_p10 }
  0x3c   :  { %2781 = shalt.err (!%p2778_p12)
}
  0x3d   :  { %s2782_s15 = scalar_lea.vmem %s2952_s30, 512  ;;  %p2787_p0 = scmp.lt.s32.totalorder %s2952_s30, %s2952_s30 }
  0x3e   :  { %p2783_p13 = scmp.ne.s32.totalorder %s2952_s30, %s2782_s15  ;;  %p2788_p1 = scmp.lt.s32.totalorder %s2782_s15, %s2782_s15 }
  0x40   :  { %p2789_p2 = por %p2788_p1, %p2787_p0 }
  0x42   :  { %p2790_p3 = pnand %p2789_p2, %p2783_p13 }
  0x44   :  { %2793 = shalt.err (!%p2790_p3)
}
  0x45   :  { %71 = dma.hbm_to_vmem [thread:$0]  %s3383_s4, 512, %s2952_s30, [#allocation9], %s2852_s2, %s2852_s2, %s2853_s18  }
  0x46   :  { %2838 = dma.done.wait [#allocation3], 256  }
  0x47   :  { %2839 = vsyncadd [#allocation3], 4294967040 }
  0x48   :  { %2840 = dma.done.wait [#allocation6], 320  }
  0x49   :  { %2841 = vsyncadd [#allocation6], 4294966976 }
  0x4a   :  { %2842 = dma.done.wait [#allocation9], 512  }
  0x4b   :  { %2843 = vsyncadd [#allocation9], 4294966784  ;;  %v2856_v0 = vmov 0.0|0.0   ;;  %vm2857_vm0 = vmmov 0   ;;  %v2858_v1 = vmov 0.0   ;;  %vm117_vm1 = vcmask 130048  }
  0x4c   :  { %2414 = vmatprep.subr.bf16.mxu1 %v2856_v0  ;;  %2167 = vmatprep.mubr.msk.f32.mxu1 %vm2857_vm0, %v2858_v1  ;;  %v108_v2 = vld [vmem:[#allocation7] sm:$0xff]  ;;  %v109_v3 = vld [vmem:[#allocation7 + $0x8] sm:$0xff]  ;;  %v94_v4 = vld [vmem:[#allocation8] sm:$0xff]  ;;  %vm212_vm2 = vcmask 261120   ;;  %s2859_s16 = smov 64   ;;  %vm323_vm3 = vcmask 523264  }
  0x4d   :  { %v2410_v5 = vpack.c.bf16 %v109_v3, %v108_v2  ;;  %v95_v6 = vld [vmem:[#allocation8 + $0x8] sm:$0xff]  ;;  %v106_v7 = vld [vmem:[#allocation2] sm:$0xff]  ;;  %v96_v9 = vld [vmem:[#allocation8 + $0x10] sm:$0xff]  ;;  %vm1954_vm4 = vcmask 254976  }
  0x4e   :  { %v2992_v8 = vpack.c.bf16 %v95_v6, %v94_v4  ;;  %2156 = vmatprep.mubr.msk.f32.mxu0 %vm117_vm1, %v106_v7  ;;  %v97_v10 = vld [vmem:[#allocation8 + $0x18] sm:$0xff]  ;;  %v107_v11 = vld [vmem:[#allocation2 + $0x8] sm:$0xff]  ;;  %v207_v23 = vld [vmem:[#allocation5] sm:$0x3] }
  0x4f   :  { %2411 = vmatprep.subr.bf16.mxu0 %v2410_v5  ;;  %v2996_v12 = vpack.c.bf16 %v97_v10, %v96_v9  ;;  %v206_v13 = vld [vmem:[%s3380_s1] sm:$0x3]  ;;  %v99_v35 = vld [vmem:[%s3385_s6 + $0x8] sm:$0xff]  ;;  %v100_v36 = vld [vmem:[%s3385_s6 + $0x10] sm:$0xff] }
  0x50   :  { %2416 = vmatpush3.bf16.msra.mxu1 %v2992_v8  ;;  %2413 = vmatpush3.bf16.msra.mxu0 %v2410_v5  ;;  %v1992_v14 = vld [vmem:[%s3384_s5] ss:$0 sm:$0xff]  ;;  %v101_v38 = vld [vmem:[%s3385_s6 + $0x18] sm:$0xff]  ;;  %v103_v41 = vld [vmem:[%s3385_s6 + $0x28] sm:$0xff] }
  0x51   :  { %2417 = vmatprep.subr.bf16.mxu1 %v2856_v0  ;;  %2420 = vmatprep.subr.bf16.mxu0 %v2856_v0  ;;  %v98_v34 = vld [vmem:[%s3385_s6] sm:$0xff]  ;;  %v3044_v39 = vpack.c.bf16 %v101_v38, %v100_v36  ;;  %v104_v43 = vld [vmem:[%s3385_s6 + $0x30] sm:$0xff]  ;;  %v105_v44 = vld [vmem:[%s3385_s6 + $0x38] sm:$0xff] }
  0x52   :  { %v3038_v37 = vpack.c.bf16 %v99_v35, %v98_v34  ;;  %v102_v40 = vld [vmem:[%s3385_s6 + $0x20] sm:$0xff]  ;;  %v3065_v46 = vpack.c.bf16 %v105_v44, %v104_v43  ;;  %v211_v63 = vld [vmem:[#allocation5 + $0x2] sm:$0x3] }
  0x53   :  { %2157 = vmatmul.mubr.msk.f32.vlgmr.msra.gmra.mrb[0].mxu0 %vm117_vm1, %v107_v11  ;;  %v3054_v42 = vpack.c.bf16 %v103_v41, %v102_v40  ;;  %v1996_v47 = vld [vmem:[%s3380_s1 + $0x2] sm:$0x3]  ;;  %v3098_v54 = vld [vmem:[%s3386_s7] ss:$0 sm:$0xff] }
  0x54   :  { %2419 = vmatpush3.bf16.msra.mxu1 %v2996_v12  ;;  %2186 = vmatprep.mubr.msk.f32.mxu0 %vm2857_vm0, %v2858_v1 }
  0x55   :  { %2432 = vmatprep.subr.bf16.mxu1 %v2856_v0  ;;  %2422 = vmatpush3.bf16.msra.mxu0 %v3038_v37 }
  0x56   :  { %2423 = vmatprep.subr.bf16.mxu0 %v2856_v0 }
  0x57   :  { %2168 = vmatmul.mubr.msk.f32.vlgmr.msra.gmra.mrb[0].mxu1 %vm212_vm2, %v206_v13 }
  0x58   :  { %2434 = vmatpush3.bf16.msra.mxu1 %v2992_v8  ;;  %2197 = vmatprep.mubr.msk.f32.mxu1 %vm2857_vm0, %v2858_v1 }
  0x59   :  { %2435 = vmatprep.subr.bf16.mxu1 %v2856_v0  ;;  %2425 = vmatpush3.bf16.msra.mxu0 %v3044_v39 }
  0x5a   :  { %2426 = vmatprep.subr.bf16.mxu0 %v2856_v0 }
  0x5c   :  { %2437 = vmatpush3.bf16.msra.mxu1 %v2996_v12 }
  0x5d   :  { %2438 = vmatprep.subr.bf16.mxu1 %v2856_v0  ;;  %2428 = vmatpush3.bf16.msra.mxu0 %v3054_v42 }
  0x5e   :  { %2429 = vmatprep.subr.bf16.mxu0 %v2856_v0 }
  0x61   :  { %2431 = vmatpush3.bf16.msra.mxu0 %v3065_v46 }
  0x62   :  { %2450 = vmatprep.subr.bf16.mxu0 %v2856_v0 }
 0x126   :  { %v2158_v15 = vpop.f32.mrb[0].mxu0 }
 0x127   :  { %v3018_v16 = vadd.f32 %v2158_v15, %v1992_v14  ;;  %v190_v17 = vpop.f32.mrb[1].mxu0 }
 0x128   :  { %v3020_v18 = vadd.f32 %v1992_v14, %v190_v17 }
 0x12a   :  { %v282_v19 = vpop.f32.mrb[0].mxu1  ;;  %v426_v53 = vrot.slane %v3020_v18, 2  ;;  %v630_v34 = vrot.slane %v3020_v18, 4 }
 0x12b   :  { %v283_v20 = vadd.f32 %v282_v19, %v3020_v18  ;;  %v2169_v21 = vpop.f32.mrb[1].mxu1 }
 0x12d   :  { %2578 = vtanh.f32 %v283_v20  ;;  %v1998_v24 = vmul.f32 -1.442695, %v283_v20 }
 0x12f   :  { %2580 = vpow2.f32 %v1998_v24 }
 0x137   :  { %v2579_v22 = vpop.eup %2578 }
 0x138   :  { %299 = vrot.lane.b32.xlu0 %v2579_v22, %s2859_s16 }
 0x139   :  { %v2581_v25 = vpop.eup %2580 }
 0x13a   :  { %v289_v26 = vadd.f32 1.0, %v2581_v25 }
 0x13c   :  { %294 = vrot.lane.b32.xlu0 %v207_v23, %s2849_s27  ;;  %2582 = vrcp.f32 %v289_v26 }
 0x146   :  { %v2583_v27 = vpop.eup %2582 }
 0x1aa   :  { %v300_v28 = vpop.permute.xlu0 %299 }
 0x1ab   :  { %v302_v29 = vmul.f32 %v2583_v27, %v300_v28 }
 0x1ad   :  { %304 = vrot.lane.b32.xlu1 %v302_v29, %s2849_s27 }
 0x1ae   :  { %v295_v30 = vpop.permute.xlu0 %294 }
 0x1af   :  { %v297_v31 = vmul.f32 %v2583_v27, %v295_v30 }
 0x21f   :  { %v305_v32 = vpop.permute.xlu1 %304 }
 0x220   :  { %v3026_v33 = vadd.f32 %v305_v32, %v297_v31 }
 0x222   :  { %2584 = vtanh.f32 %v3026_v33 }
 0x22c   :  { %v2585_v45 = vpop.eup %2584 }
 0x22d   :  { %310 = vrot.lane.b32.xlu1 %v2585_v45, %s2859_s16 }
 0x231   :  { %319 = vrot.lane.b32.xlu1 %v1996_v47, %s2849_s27 }
 0x29f   :  { %v311_v48 = vpop.permute.xlu1 %310 }
 0x2a0   :  { %v313_v49 = vmul.f32 %v2583_v27, %v311_v48 }
 0x2a2   :  { %315 = vrot.lane.b32.xlu0 %v313_v49, %s2849_s27 }
 0x2a3   :  { %v320_v50 = vpop.permute.xlu1 %319 }
 0x314   :  { %v316_v51 = vpop.permute.xlu0 %315 }
 0x315   :  { %v322_v52 = vsel %vm212_vm2, %v316_v51, %v320_v50  ;;  %2198 = vmatmul.mubr.msk.f32.vlgmr.msra.gmra.mrb[2].mxu1 %vm212_vm2, %v316_v51 }
 0x316   :  { %2187 = vmatmul.mubr.msk.f32.vlgmr.msra.gmra.mrb[2].mxu0 %vm323_vm3, %v322_v52  ;;  %2440 = vmatpush3.bf16.msra.mxu1 %v3038_v37 }
 0x317   :  { %2441 = vmatprep.subr.bf16.mxu1 %v2856_v0  ;;  %2452 = vmatpush3.bf16.msra.mxu0 %v2992_v8 }
 0x318   :  { %2453 = vmatprep.subr.bf16.mxu0 %v2856_v0  ;;  %2227 = vmatprep.mubr.msk.f32.mxu0 %vm2857_vm0, %v2858_v1 }
 0x319   :  { %2216 = vmatprep.mubr.msk.f32.mxu1 %vm2857_vm0, %v2858_v1 }
 0x31a   :  { %2443 = vmatpush3.bf16.msra.mxu1 %v3044_v39 }
 0x31b   :  { %2444 = vmatprep.subr.bf16.mxu1 %v2856_v0  ;;  %2455 = vmatpush3.bf16.msra.mxu0 %v2996_v12 }
 0x31c   :  { %2456 = vmatprep.subr.bf16.mxu0 %v2856_v0 }
 0x31e   :  { %2446 = vmatpush3.bf16.msra.mxu1 %v3054_v42 }
 0x31f   :  { %2447 = vmatprep.subr.bf16.mxu1 %v2856_v0 }
 0x322   :  { %2449 = vmatpush3.bf16.msra.mxu1 %v3065_v46 }
 0x323   :  { %2468 = vmatprep.subr.bf16.mxu1 %v2856_v0 }
 0x3e8   :  { %v496_v55 = vpop.f32.mrb[2].mxu1 }
 0x3e9   :  { %v497_v56 = vadd.f32 %v496_v55, %v426_v53  ;;  %v393_v57 = vpop.f32.mrb[2].mxu0  ;;  %v2199_v58 = vpop.f32.mrb[3].mxu1 }
 0x3ea   :  { %v394_v59 = vadd.f32 %v3098_v54, %v393_v57  ;;  %v2188_v60 = vpop.f32.mrb[3].mxu0 }
 0x3eb   :  { %2586 = vtanh.f32 %v497_v56  ;;  %v2002_v2 = vmul.f32 -1.442695, %v497_v56 }
 0x3ec   :  { %2588 = vtanh.f32 %v394_v59  ;;  %v2000_v3 = vmul.f32 -1.442695, %v394_v59 }
 0x3ed   :  { %2590 = vpow2.f32 %v2002_v2 }
 0x3ee   :  { %2592 = vpow2.f32 %v2000_v3 }
 0x3f5   :  { %v2587_v61 = vpop.eup %2586 }
 0x3f6   :  { %v2589_v62 = vpop.eup %2588  ;;  %509 = vrot.lane.b32.xlu1 %v2587_v61, %s2859_s16 }
 0x3f7   :  { %410 = vrot.lane.b32.xlu0 %v2589_v62, %s2859_s16  ;;  %v2591_v4 = vpop.eup %2590 }
 0x3f8   :  { %v2593_v5 = vpop.eup %2592  ;;  %v503_v6 = vadd.f32 1.0, %v2591_v4 }
 0x3f9   :  { %v400_v7 = vadd.f32 1.0, %v2593_v5 }
 0x3fa   :  { %2594 = vrcp.f32 %v503_v6 }
 0x3fb   :  { %405 = vrot.lane.b32.xlu0 %v211_v63, %s2849_s27  ;;  %2596 = vrcp.f32 %v400_v7 }
 0x404   :  { %v2595_v9 = vpop.eup %2594 }
 0x405   :  { %v2597_v11 = vpop.eup %2596  ;;  %v507_v19 = vmul.f32 %v2595_v9, %v3026_v33 }
 0x468   :  { %v510_v10 = vpop.permute.xlu1 %509 }
 0x469   :  { %v512_v13 = vmul.f32 %v2595_v9, %v510_v10  ;;  %v411_v14 = vpop.permute.xlu0 %410 }
 0x46a   :  { %v413_v15 = vmul.f32 %v2597_v11, %v411_v14 }
 0x46b   :  { %514 = vrot.lane.b32.xlu0 %v512_v13, %s2849_s27 }
 0x46c   :  { %415 = vrot.lane.b32.xlu1 %v413_v15, %s2849_s27  ;;  %v834_v15 = vrot.slane %v3020_v18, 6 }
 0x46d   :  { %v406_v17 = vpop.permute.xlu0 %405 }
 0x46e   :  { %v408_v20 = vmul.f32 %v2597_v11, %v406_v17 }
 0x4dd   :  { %v515_v21 = vpop.permute.xlu0 %514 }
 0x4de   :  { %v3107_v22 = vadd.f32 %v515_v21, %v507_v19  ;;  %v416_v23 = vpop.permute.xlu1 %415 }
 0x4df   :  { %v3109_v24 = vadd.f32 %v416_v23, %v408_v20 }
 0x4e0   :  { %2598 = vtanh.f32 %v3107_v22 }
 0x4e1   :  { %2600 = vtanh.f32 %v3109_v24 }
 0x4ea   :  { %v2599_v25 = vpop.eup %2598 }
 0x4eb   :  { %v2601_v26 = vpop.eup %2600  ;;  %520 = vrot.lane.b32.xlu0 %v2599_v25, %s2859_s16 }
 0x4ec   :  { %421 = vrot.lane.b32.xlu1 %v2601_v26, %s2859_s16 }
 0x55d   :  { %v521_v27 = vpop.permute.xlu0 %520 }
 0x55e   :  { %v523_v28 = vmul.f32 %v2595_v9, %v521_v27  ;;  %v422_v29 = vpop.permute.xlu1 %421 }
 0x55f   :  { %v424_v30 = vmul.f32 %v2597_v11, %v422_v29 }
 0x560   :  { %525 = vrot.lane.b32.xlu1 %v523_v28, %s2849_s27 }
 0x561   :  { %529 = vrot.lane.b32.xlu0 %v424_v30, %s2859_s16 }
 0x5d2   :  { %v526_v31 = vpop.permute.xlu1 %525 }
 0x5d3   :  { %2228 = vmatmul.mubr.msk.f32.vlgmr.msra.gmra.mrb[4].mxu0 %vm212_vm2, %v526_v31  ;;  %v530_v32 = vpop.permute.xlu0 %529 }
 0x5d4   :  { %v532_v33 = vsel %vm212_vm2, %v526_v31, %v530_v32  ;;  %2458 = vmatpush3.bf16.msra.mxu0 %v3038_v37  ;;  %2246 = vmatprep.mubr.msk.f32.mxu0 %vm2857_vm0, %v2858_v1 }
 0x5d5   :  { %2217 = vmatmul.mubr.msk.f32.vlgmr.msra.gmra.mrb[4].mxu1 %vm323_vm3, %v532_v33  ;;  %2459 = vmatprep.subr.bf16.mxu0 %v2856_v0 }
 0x5d6   :  { %2470 = vmatpush3.bf16.msra.mxu1 %v2992_v8  ;;  %2257 = vmatprep.mubr.msk.f32.mxu1 %vm2857_vm0, %v2858_v1 }
 0x5d7   :  { %2471 = vmatprep.subr.bf16.mxu1 %v2856_v0 }
 0x5d8   :  { %2461 = vmatpush3.bf16.msra.mxu0 %v3044_v39 }
 0x5d9   :  { %2462 = vmatprep.subr.bf16.mxu0 %v2856_v0 }
 0x5da   :  { %2473 = vmatpush3.bf16.msra.mxu1 %v2996_v12 }
 0x5db   :  { %2474 = vmatprep.subr.bf16.mxu1 %v2856_v0 }
 0x5dc   :  { %2464 = vmatpush3.bf16.msra.mxu0 %v3054_v42 }
 0x5dd   :  { %2465 = vmatprep.subr.bf16.mxu0 %v2856_v0 }
 0x5e0   :  { %2467 = vmatpush3.bf16.msra.mxu0 %v3065_v46 }
 0x5e1   :  { %2486 = vmatprep.subr.bf16.mxu0 %v2856_v0 }
 0x6a6   :  { %v700_v35 = vpop.f32.mrb[4].mxu0 }
 0x6a7   :  { %v701_v36 = vadd.f32 %v700_v35, %v630_v34  ;;  %v2229_v38 = vpop.f32.mrb[5].mxu0 }
 0x6a8   :  { %v602_v40 = vpop.f32.mrb[4].mxu1 }
 0x6a9   :  { %2602 = vtanh.f32 %v701_v36  ;;  %v603_v41 = vadd.f32 %v3098_v54, %v602_v40  ;;  %v2218_v43 = vpop.f32.mrb[5].mxu1  ;;  %v2006_v47 = vmul.f32 -1.442695, %v701_v36 }
 0x6ab   :  { %2604 = vtanh.f32 %v603_v41  ;;  %v2004_v48 = vmul.f32 -1.442695, %v603_v41 }
 0x6ac   :  { %2606 = vpow2.f32 %v2006_v47 }
 0x6ad   :  { %2608 = vpow2.f32 %v2004_v48 }
 0x6b3   :  { %v2603_v44 = vpop.eup %2602 }
 0x6b4   :  { %713 = vrot.lane.b32.xlu0 %v2603_v44, %s2859_s16 }
 0x6b5   :  { %v2605_v45 = vpop.eup %2604 }
 0x6b6   :  { %615 = vrot.lane.b32.xlu1 %v2605_v45, %s2859_s16  ;;  %v2607_v49 = vpop.eup %2606 }
 0x6b7   :  { %v2609_v50 = vpop.eup %2608  ;;  %v707_v51 = vadd.f32 1.0, %v2607_v49 }
 0x6b8   :  { %v609_v52 = vadd.f32 1.0, %v2609_v50 }
 0x6b9   :  { %2610 = vrcp.f32 %v707_v51 }
 0x6ba   :  { %2612 = vrcp.f32 %v609_v52 }
 0x6c3   :  { %v2611_v53 = vpop.eup %2610 }
 0x6c4   :  { %v2613_v57 = vpop.eup %2612  ;;  %v711_v60 = vmul.f32 %v2611_v53, %v3107_v22 }
 0x6c5   :  { %v613_v63 = vmul.f32 %v2613_v57, %v3109_v24 }
 0x726   :  { %v714_v55 = vpop.permute.xlu0 %713 }
 0x727   :  { %v716_v56 = vmul.f32 %v2611_v53, %v714_v55 }
 0x728   :  { %v616_v58 = vpop.permute.xlu1 %615 }
 0x729   :  { %718 = vrot.lane.b32.xlu0 %v716_v56, %s2849_s27  ;;  %v618_v59 = vmul.f32 %v2613_v57, %v616_v58 }
 0x72b   :  { %620 = vrot.lane.b32.xlu1 %v618_v59, %s2849_s27 }
 0x79b   :  { %v719_v61 = vpop.permute.xlu0 %718 }
 0x79c   :  { %v3143_v62 = vadd.f32 %v719_v61, %v711_v60 }
 0x79d   :  { %v621_v2 = vpop.permute.xlu1 %620 }
 0x79e   :  { %2614 = vtanh.f32 %v3143_v62  ;;  %v3147_v3 = vadd.f32 %v621_v2, %v613_v63 }
 0x7a0   :  { %2616 = vtanh.f32 %v3147_v3 }
 0x7a8   :  { %v2615_v4 = vpop.eup %2614 }
 0x7a9   :  { %724 = vrot.lane.b32.xlu0 %v2615_v4, %s2859_s16 }
 0x7aa   :  { %v2617_v5 = vpop.eup %2616 }
 0x7ab   :  { %626 = vrot.lane.b32.xlu1 %v2617_v5, %s2859_s16 }
 0x81b   :  { %v725_v6 = vpop.permute.xlu0 %724 }
 0x81c   :  { %v727_v7 = vmul.f32 %v2611_v53, %v725_v6 }
 0x81d   :  { %v627_v9 = vpop.permute.xlu1 %626 }
 0x81e   :  { %729 = vrot.lane.b32.xlu1 %v727_v7, %s2849_s27  ;;  %v629_v10 = vmul.f32 %v2613_v57, %v627_v9 }
 0x820   :  { %733 = vrot.lane.b32.xlu0 %v629_v10, %s2859_s16 }
 0x890   :  { %v730_v11 = vpop.permute.xlu1 %729 }
 0x891   :  { %2258 = vmatmul.mubr.msk.f32.vlgmr.msra.gmra.mrb[6].mxu1 %vm212_vm2, %v730_v11 }
 0x892   :  { %2476 = vmatpush3.bf16.msra.mxu1 %v3038_v37  ;;  %2276 = vmatprep.mubr.msk.f32.mxu1 %vm2857_vm0, %v2858_v1  ;;  %v734_v13 = vpop.permute.xlu0 %733 }
 0x893   :  { %2477 = vmatprep.subr.bf16.mxu1 %v2856_v0  ;;  %v736_v14 = vsel %vm212_vm2, %v730_v11, %v734_v13 }
 0x894   :  { %2247 = vmatmul.mubr.msk.f32.vlgmr.msra.gmra.mrb[6].mxu0 %vm323_vm3, %v736_v14 }
 0x895   :  { %2488 = vmatpush3.bf16.msra.mxu0 %v2992_v8  ;;  %2287 = vmatprep.mubr.msk.f32.mxu0 %vm2857_vm0, %v2858_v1 }
 0x896   :  { %2479 = vmatpush3.bf16.msra.mxu1 %v3044_v39  ;;  %2489 = vmatprep.subr.bf16.mxu0 %v2856_v0 }
 0x897   :  { %2480 = vmatprep.subr.bf16.mxu1 %v2856_v0 }
 0x899   :  { %2491 = vmatpush3.bf16.msra.mxu0 %v2996_v12 }
 0x89a   :  { %2482 = vmatpush3.bf16.msra.mxu1 %v3054_v42  ;;  %2492 = vmatprep.subr.bf16.mxu0 %v2856_v0 }
 0x89b   :  { %2483 = vmatprep.subr.bf16.mxu1 %v2856_v0 }
 0x89e   :  { %2485 = vmatpush3.bf16.msra.mxu1 %v3065_v46 }
 0x89f   :  { %2504 = vmatprep.subr.bf16.mxu1 %v2856_v0 }
 0x964   :  { %v904_v17 = vpop.f32.mrb[6].mxu1 }
 0x965   :  { %v905_v19 = vadd.f32 %v904_v17, %v834_v15  ;;  %v2259_v20 = vpop.f32.mrb[7].mxu1 }
 0x967   :  { %2618 = vtanh.f32 %v905_v19  ;;  %v806_v21 = vpop.f32.mrb[6].mxu0  ;;  %v2010_v26 = vmul.f32 -1.442695, %v905_v19 }
 0x968   :  { %v807_v22 = vadd.f32 %v3098_v54, %v806_v21  ;;  %v2248_v23 = vpop.f32.mrb[7].mxu0 }
 0x96a   :  { %2620 = vtanh.f32 %v807_v22  ;;  %v2008_v27 = vmul.f32 -1.442695, %v807_v22 }
 0x96b   :  { %2622 = vpow2.f32 %v2010_v26 }
 0x96c   :  { %2624 = vpow2.f32 %v2008_v27 }
 0x971   :  { %v2619_v24 = vpop.eup %2618 }
 0x972   :  { %917 = vrot.lane.b32.xlu0 %v2619_v24, %s2859_s16 }
 0x974   :  { %v2621_v25 = vpop.eup %2620 }
 0x975   :  { %819 = vrot.lane.b32.xlu1 %v2621_v25, %s2859_s16  ;;  %v2623_v18 = vpop.eup %2622 }
 0x976   :  { %v911_v28 = vadd.f32 1.0, %v2623_v18  ;;  %v2625_v29 = vpop.eup %2624 }
 0x977   :  { %v813_v30 = vadd.f32 1.0, %v2625_v29 }
 0x978   :  { %2626 = vrcp.f32 %v911_v28 }
 0x979   :  { %2628 = vrcp.f32 %v813_v30 }
 0x982   :  { %v2627_v31 = vpop.eup %2626 }
 0x983   :  { %v2629_v34 = vpop.eup %2628  ;;  %v915_v38 = vmul.f32 %v2627_v31, %v3143_v62 }
 0x984   :  { %v817_v43 = vmul.f32 %v2629_v34, %v3147_v3 }
 0x9e4   :  { %v918_v32 = vpop.permute.xlu0 %917 }
 0x9e5   :  { %v920_v33 = vmul.f32 %v2627_v31, %v918_v32 }
 0x9e7   :  { %922 = vrot.lane.b32.xlu0 %v920_v33, %s2849_s27  ;;  %v820_v35 = vpop.permute.xlu1 %819  ;;  %v1241_v33 = vrot.slane %v3018_v16, 2 }
 0x9e8   :  { %v822_v36 = vmul.f32 %v2629_v34, %v820_v35 }
 0x9ea   :  { %824 = vrot.lane.b32.xlu1 %v822_v36, %s2849_s27 }
 0xa59   :  { %v923_v40 = vpop.permute.xlu0 %922 }
 0xa5a   :  { %v3180_v41 = vadd.f32 %v923_v40, %v915_v38 }
 0xa5c   :  { %2630 = vtanh.f32 %v3180_v41  ;;  %v825_v44 = vpop.permute.xlu1 %824 }
 0xa5d   :  { %v3184_v45 = vadd.f32 %v825_v44, %v817_v43 }
 0xa5f   :  { %2632 = vtanh.f32 %v3184_v45 }
 0xa66   :  { %v2631_v47 = vpop.eup %2630 }
 0xa67   :  { %928 = vrot.lane.b32.xlu0 %v2631_v47, %s2859_s16 }
 0xa69   :  { %v2633_v48 = vpop.eup %2632 }
 0xa6a   :  { %830 = vrot.lane.b32.xlu1 %v2633_v48, %s2859_s16 }
 0xad9   :  { %v929_v49 = vpop.permute.xlu0 %928 }
 0xada   :  { %v931_v50 = vmul.f32 %v2627_v31, %v929_v49 }
 0xadc   :  { %933 = vrot.lane.b32.xlu1 %v931_v50, %s2849_s27  ;;  %v831_v51 = vpop.permute.xlu1 %830 }
 0xadd   :  { %v833_v52 = vmul.f32 %v2629_v34, %v831_v51 }
 0xadf   :  { %937 = vrot.lane.b32.xlu0 %v833_v52, %s2859_s16 }
 0xb4e   :  { %v934_v53 = vpop.permute.xlu1 %933 }
 0xb4f   :  { %2288 = vmatmul.mubr.msk.f32.vlgmr.msra.gmra.mrb[8].mxu0 %vm212_vm2, %v934_v53 }
 0xb50   :  { %2494 = vmatpush3.bf16.msra.mxu0 %v3038_v37  ;;  %2306 = vmatprep.mubr.msk.f32.mxu0 %vm2857_vm0, %v2858_v1 }
 0xb51   :  { %2495 = vmatprep.subr.bf16.mxu0 %v2856_v0  ;;  %v938_v55 = vpop.permute.xlu0 %937 }
 0xb52   :  { %v940_v56 = vsel %vm212_vm2, %v934_v53, %v938_v55 }
 0xb53   :  { %2277 = vmatmul.mubr.msk.f32.vlgmr.msra.gmra.mrb[8].mxu1 %vm323_vm3, %v940_v56 }
 0xb54   :  { %2497 = vmatpush3.bf16.msra.mxu0 %v3044_v39  ;;  %2506 = vmatpush3.bf16.msra.mxu1 %v2992_v8 }
 0xb55   :  { %2498 = vmatprep.subr.bf16.mxu0 %v2856_v0  ;;  %2507 = vmatprep.subr.bf16.mxu1 %v2856_v0 }
 0xb56   :  { %2317 = vmatprep.mubr.msk.f32.mxu1 %vm2857_vm0, %v2858_v1 }
 0xb58   :  { %2500 = vmatpush3.bf16.msra.mxu0 %v3054_v42  ;;  %2509 = vmatpush3.bf16.msra.mxu1 %v2996_v12 }
 0xb59   :  { %2501 = vmatprep.subr.bf16.mxu0 %v2856_v0  ;;  %2510 = vmatprep.subr.bf16.mxu1 %v2856_v0 }
 0xb5c   :  { %2503 = vmatpush3.bf16.msra.mxu0 %v3065_v46 }
 0xb5d   :  { %2522 = vmatprep.subr.bf16.mxu0 %v2856_v0 }
 0xc22   :  { %v1106_v57 = vpop.f32.mrb[8].mxu0 }
 0xc23   :  { %v1107_v58 = vadd.f32 %v1106_v57, %v3018_v16  ;;  %v2289_v59 = vpop.f32.mrb[9].mxu0 }
 0xc25   :  { %2634 = vtanh.f32 %v1107_v58  ;;  %v2014_v3 = vmul.f32 -1.442695, %v1107_v58 }
 0xc26   :  { %v1010_v60 = vpop.f32.mrb[8].mxu1 }
 0xc27   :  { %v1011_v61 = vadd.f32 %v3098_v54, %v1010_v60  ;;  %v2278_v62 = vpop.f32.mrb[9].mxu1 }
 0xc29   :  { %2636 = vtanh.f32 %v1011_v61  ;;  %v2012_v4 = vmul.f32 -1.442695, %v1011_v61 }
 0xc2a   :  { %2638 = vpow2.f32 %v2014_v3 }
 0xc2b   :  { %2640 = vpow2.f32 %v2012_v4 }
 0xc2f   :  { %v2635_v63 = vpop.eup %2634 }
 0xc30   :  { %1119 = vrot.lane.b32.xlu0 %v2635_v63, %s2859_s16 }
 0xc33   :  { %v2637_v2 = vpop.eup %2636 }
 0xc34   :  { %1023 = vrot.lane.b32.xlu1 %v2637_v2, %s2859_s16  ;;  %v2639_v5 = vpop.eup %2638 }
 0xc35   :  { %v1113_v6 = vadd.f32 1.0, %v2639_v5  ;;  %v2641_v7 = vpop.eup %2640 }
 0xc36   :  { %v1017_v9 = vadd.f32 1.0, %v2641_v7 }
 0xc37   :  { %2642 = vrcp.f32 %v1113_v6 }
 0xc38   :  { %2644 = vrcp.f32 %v1017_v9 }
 0xc41   :  { %v2643_v10 = vpop.eup %2642 }
 0xc42   :  { %v2645_v14 = vpop.eup %2644  ;;  %v1117_v19 = vmul.f32 %v2643_v10, %v3180_v41 }
 0xc43   :  { %v1021_v22 = vmul.f32 %v2645_v14, %v3184_v45 }
 0xca2   :  { %v1120_v11 = vpop.permute.xlu0 %1119 }
 0xca3   :  { %v1122_v13 = vmul.f32 %v2643_v10, %v1120_v11 }
 0xca5   :  { %1124 = vrot.lane.b32.xlu0 %v1122_v13, %s2849_s27 }
 0xca6   :  { %v1024_v15 = vpop.permute.xlu1 %1023 }
 0xca7   :  { %v1026_v17 = vmul.f32 %v2645_v14, %v1024_v15 }
 0xca9   :  { %1028 = vrot.lane.b32.xlu1 %v1026_v17, %s2849_s27 }
 0xd17   :  { %v1125_v20 = vpop.permute.xlu0 %1124 }
 0xd18   :  { %v3217_v21 = vadd.f32 %v1125_v20, %v1117_v19 }
 0xd1a   :  { %2646 = vtanh.f32 %v3217_v21 }
 0xd1b   :  { %v1029_v23 = vpop.permute.xlu1 %1028 }
 0xd1c   :  { %v3221_v24 = vadd.f32 %v1029_v23, %v1021_v22 }
 0xd1e   :  { %2648 = vtanh.f32 %v3221_v24 }
 0xd24   :  { %v2647_v25 = vpop.eup %2646 }
 0xd25   :  { %1130 = vrot.lane.b32.xlu0 %v2647_v25, %s2859_s16 }
 0xd28   :  { %v2649_v26 = vpop.eup %2648 }
 0xd29   :  { %1034 = vrot.lane.b32.xlu1 %v2649_v26, %s2859_s16 }
 0xd97   :  { %v1131_v27 = vpop.permute.xlu0 %1130 }
 0xd98   :  { %v1133_v18 = vmul.f32 %v2643_v10, %v1131_v27 }
 0xd9a   :  { %1135 = vrot.lane.b32.xlu1 %v1133_v18, %s2849_s27 }
 0xd9b   :  { %v1035_v28 = vpop.permute.xlu1 %1034 }
 0xd9c   :  { %v1037_v29 = vmul.f32 %v2645_v14, %v1035_v28  ;;  %v1445_v14 = vrot.slane %v3018_v16, 4 }
 0xd9e   :  { %1139 = vrot.lane.b32.xlu0 %v1037_v29, %s2859_s16 }
 0xe0c   :  { %v1136_v30 = vpop.permute.xlu1 %1135 }
 0xe0d   :  { %2318 = vmatmul.mubr.msk.f32.vlgmr.msra.gmra.mrb[10].mxu1 %vm212_vm2, %v1136_v30 }
 0xe0e   :  { %2512 = vmatpush3.bf16.msra.mxu1 %v3038_v37  ;;  %2336 = vmatprep.mubr.msk.f32.mxu1 %vm2857_vm0, %v2858_v1 }
 0xe0f   :  { %2513 = vmatprep.subr.bf16.mxu1 %v2856_v0 }
 0xe10   :  { %v1140_v31 = vpop.permute.xlu0 %1139 }
 0xe11   :  { %v1142_v32 = vsel %vm212_vm2, %v1136_v30, %v1140_v31 }
 0xe12   :  { %2515 = vmatpush3.bf16.msra.mxu1 %v3044_v39  ;;  %2307 = vmatmul.mubr.msk.f32.vlgmr.msra.gmra.mrb[10].mxu0 %vm323_vm3, %v1142_v32 }
 0xe13   :  { %2516 = vmatprep.subr.bf16.mxu1 %v2856_v0  ;;  %2524 = vmatpush3.bf16.msra.mxu0 %v2992_v8 }
 0xe14   :  { %2347 = vmatprep.mubr.msk.f32.mxu0 %vm2857_vm0, %v2858_v1  ;;  %2525 = vmatprep.subr.bf16.mxu0 %v2856_v0 }
 0xe16   :  { %2518 = vmatpush3.bf16.msra.mxu1 %v3054_v42 }
 0xe17   :  { %2519 = vmatprep.subr.bf16.mxu1 %v2856_v0  ;;  %2527 = vmatpush3.bf16.msra.mxu0 %v2996_v12 }
 0xe18   :  { %2528 = vmatprep.subr.bf16.mxu0 %v2856_v0 }
 0xe1a   :  { %2521 = vmatpush3.bf16.msra.mxu1 %v3065_v46 }
 0xe1b   :  { %2540 = vmatprep.subr.bf16.mxu1 %v2856_v0 }
 0xee0   :  { %v1311_v34 = vpop.f32.mrb[10].mxu1 }
 0xee1   :  { %v1312_v35 = vadd.f32 %v1311_v34, %v1241_v33  ;;  %v2319_v36 = vpop.f32.mrb[11].mxu1 }
 0xee3   :  { %2650 = vtanh.f32 %v1312_v35  ;;  %v2018_v45 = vmul.f32 -1.442695, %v1312_v35 }
 0xee5   :  { %v1212_v38 = vpop.f32.mrb[10].mxu0 }
 0xee6   :  { %v1213_v40 = vadd.f32 %v3098_v54, %v1212_v38  ;;  %v2308_v41 = vpop.f32.mrb[11].mxu0 }
 0xee8   :  { %2652 = vtanh.f32 %v1213_v40  ;;  %v2016_v47 = vmul.f32 -1.442695, %v1213_v40 }
 0xee9   :  { %2654 = vpow2.f32 %v2018_v45 }
 0xeea   :  { %2656 = vpow2.f32 %v2016_v47 }
 0xeed   :  { %v2651_v43 = vpop.eup %2650 }
 0xeee   :  { %1324 = vrot.lane.b32.xlu0 %v2651_v43, %s2859_s16 }
 0xef2   :  { %v2653_v44 = vpop.eup %2652 }
 0xef3   :  { %1225 = vrot.lane.b32.xlu1 %v2653_v44, %s2859_s16  ;;  %v2655_v48 = vpop.eup %2654 }
 0xef4   :  { %v1318_v49 = vadd.f32 1.0, %v2655_v48  ;;  %v2657_v50 = vpop.eup %2656 }
 0xef5   :  { %v1219_v51 = vadd.f32 1.0, %v2657_v50 }
 0xef6   :  { %2658 = vrcp.f32 %v1318_v49 }
 0xef7   :  { %2660 = vrcp.f32 %v1219_v51 }
 0xf00   :  { %v2659_v52 = vpop.eup %2658 }
 0xf01   :  { %v2661_v56 = vpop.eup %2660  ;;  %v1322_v59 = vmul.f32 %v2659_v52, %v3217_v21 }
 0xf02   :  { %v1223_v62 = vmul.f32 %v2661_v56, %v3221_v24 }
 0xf60   :  { %v1325_v53 = vpop.permute.xlu0 %1324 }
 0xf61   :  { %v1327_v55 = vmul.f32 %v2659_v52, %v1325_v53 }
 0xf63   :  { %1329 = vrot.lane.b32.xlu0 %v1327_v55, %s2849_s27 }
 0xf65   :  { %v1226_v57 = vpop.permute.xlu1 %1225 }
 0xf66   :  { %v1228_v58 = vmul.f32 %v2661_v56, %v1226_v57 }
 0xf68   :  { %1230 = vrot.lane.b32.xlu1 %v1228_v58, %s2849_s27 }
 0xfd5   :  { %v1330_v60 = vpop.permute.xlu0 %1329 }
 0xfd6   :  { %v3254_v61 = vadd.f32 %v1330_v60, %v1322_v59 }
 0xfd8   :  { %2662 = vtanh.f32 %v3254_v61 }
 0xfda   :  { %v1231_v63 = vpop.permute.xlu1 %1230 }
 0xfdb   :  { %v3258_v2 = vadd.f32 %v1231_v63, %v1223_v62 }
 0xfdd   :  { %2664 = vtanh.f32 %v3258_v2 }
 0xfe2   :  { %v2663_v3 = vpop.eup %2662 }
 0xfe3   :  { %1335 = vrot.lane.b32.xlu0 %v2663_v3, %s2859_s16 }
 0xfe7   :  { %v2665_v4 = vpop.eup %2664 }
 0xfe8   :  { %1236 = vrot.lane.b32.xlu1 %v2665_v4, %s2859_s16 }
0x1055   :  { %v1336_v5 = vpop.permute.xlu0 %1335 }
0x1056   :  { %v1338_v6 = vmul.f32 %v2659_v52, %v1336_v5 }
0x1058   :  { %1340 = vrot.lane.b32.xlu1 %v1338_v6, %s2849_s27 }
0x105a   :  { %v1237_v7 = vpop.permute.xlu1 %1236 }
0x105b   :  { %v1239_v9 = vmul.f32 %v2661_v56, %v1237_v7 }
0x105d   :  { %1344 = vrot.lane.b32.xlu0 %v1239_v9, %s2859_s16 }
0x10ca   :  { %v1341_v10 = vpop.permute.xlu1 %1340 }
0x10cb   :  { %2348 = vmatmul.mubr.msk.f32.vlgmr.msra.gmra.mrb[12].mxu0 %vm212_vm2, %v1341_v10 }
0x10cc   :  { %2530 = vmatpush3.bf16.msra.mxu0 %v3038_v37  ;;  %2366 = vmatprep.mubr.msk.f32.mxu0 %vm2857_vm0, %v2858_v1 }
0x10cd   :  { %2531 = vmatprep.subr.bf16.mxu0 %v2856_v0 }
0x10cf   :  { %v1345_v11 = vpop.permute.xlu0 %1344 }
0x10d0   :  { %2533 = vmatpush3.bf16.msra.mxu0 %v3044_v39  ;;  %v1347_v13 = vsel %vm212_vm2, %v1341_v10, %v1345_v11 }
0x10d1   :  { %2534 = vmatprep.subr.bf16.mxu0 %v2856_v0  ;;  %2337 = vmatmul.mubr.msk.f32.vlgmr.msra.gmra.mrb[12].mxu1 %vm323_vm3, %v1347_v13 }
0x10d2   :  { %2542 = vmatpush3.bf16.msra.mxu1 %v2992_v8  ;;  %2377 = vmatprep.mubr.msk.f32.mxu1 %vm2857_vm0, %v2858_v1 }
0x10d3   :  { %2543 = vmatprep.subr.bf16.mxu1 %v2856_v0 }
0x10d4   :  { %2536 = vmatpush3.bf16.msra.mxu0 %v3054_v42 }
0x10d5   :  { %2537 = vmatprep.subr.bf16.mxu0 %v2856_v0 }
0x10d6   :  { %2545 = vmatpush3.bf16.msra.mxu1 %v2996_v12 }
0x10d7   :  { %2546 = vmatprep.subr.bf16.mxu1 %v2856_v0 }
0x10d8   :  { %2539 = vmatpush3.bf16.msra.mxu0 %v3065_v46 }
0x10d9   :  { %2558 = vmatprep.subr.bf16.mxu0 %v2856_v0 }
0x119e   :  { %v1515_v8 = vpop.f32.mrb[12].mxu0 }
0x119f   :  { %v1516_v15 = vadd.f32 %v1515_v8, %v1445_v14  ;;  %v2349_v17 = vpop.f32.mrb[13].mxu0 }
0x11a1   :  { %2666 = vtanh.f32 %v1516_v15  ;;  %v2022_v23 = vmul.f32 -1.442695, %v1516_v15 }
0x11a4   :  { %v1417_v19 = vpop.f32.mrb[12].mxu1 }
0x11a5   :  { %v1418_v20 = vadd.f32 %v3098_v54, %v1417_v19  ;;  %v2338_v21 = vpop.f32.mrb[13].mxu1 }
0x11a7   :  { %2668 = vtanh.f32 %v1418_v20  ;;  %v2020_v24 = vmul.f32 -1.442695, %v1418_v20 }
0x11a8   :  { %2670 = vpow2.f32 %v2022_v23 }
0x11a9   :  { %2672 = vpow2.f32 %v2020_v24 }
0x11ab   :  { %v2667_v22 = vpop.eup %2666 }
0x11ac   :  { %1528 = vrot.lane.b32.xlu0 %v2667_v22, %s2859_s16 }
0x11b1   :  { %v2669_v12 = vpop.eup %2668 }
0x11b2   :  { %1430 = vrot.lane.b32.xlu1 %v2669_v12, %s2859_s16  ;;  %v2671_v25 = vpop.eup %2670 }
0x11b3   :  { %v1522_v26 = vadd.f32 1.0, %v2671_v25  ;;  %v2673_v27 = vpop.eup %2672 }
0x11b4   :  { %v1424_v18 = vadd.f32 1.0, %v2673_v27 }
0x11b5   :  { %2674 = vrcp.f32 %v1522_v26 }
0x11b6   :  { %2676 = vrcp.f32 %v1424_v18 }
0x11bf   :  { %v2675_v28 = vpop.eup %2674 }
0x11c0   :  { %v2677_v31 = vpop.eup %2676  ;;  %v1526_v34 = vmul.f32 %v2675_v28, %v3254_v61 }
0x11c1   :  { %v1428_v38 = vmul.f32 %v2677_v31, %v3258_v2 }
0x121e   :  { %v1529_v29 = vpop.permute.xlu0 %1528 }
0x121f   :  { %v1531_v30 = vmul.f32 %v2675_v28, %v1529_v29 }
0x1221   :  { %1533 = vrot.lane.b32.xlu0 %v1531_v30, %s2849_s27 }
0x1224   :  { %v1431_v32 = vpop.permute.xlu1 %1430 }
0x1225   :  { %v1433_v33 = vmul.f32 %v2677_v31, %v1431_v32 }
0x1227   :  { %1435 = vrot.lane.b32.xlu1 %v1433_v33, %s2849_s27 }
0x1293   :  { %v1534_v35 = vpop.permute.xlu0 %1533 }
0x1294   :  { %v1536_v36 = vadd.f32 %v1534_v35, %v1526_v34 }
0x1296   :  { %2678 = vtanh.f32 %v1536_v36 }
0x1299   :  { %v1436_v40 = vpop.permute.xlu1 %1435 }
0x129a   :  { %v1438_v41 = vadd.f32 %v1436_v40, %v1428_v38  ;;  %v1855_v38 = vld [vmem:[%s3387_s8 + $0x10] sm:$0xff] }
0x129c   :  { %2680 = vtanh.f32 %v1438_v41 }
0x12a0   :  { %v2679_v43 = vpop.eup %2678 }
0x12a1   :  { %1539 = vrot.lane.b32.xlu0 %v2679_v43, %s2859_s16 }
0x12a6   :  { %v2681_v44 = vpop.eup %2680 }
0x12a7   :  { %1441 = vrot.lane.b32.xlu1 %v2681_v44, %s2859_s16 }
0x1313   :  { %v1540_v45 = vpop.permute.xlu0 %1539 }
0x1314   :  { %v1542_v47 = vmul.f32 %v2675_v28, %v1540_v45 }
0x1316   :  { %1544 = vrot.lane.b32.xlu1 %v1542_v47, %s2849_s27 }
0x1319   :  { %v1442_v48 = vpop.permute.xlu1 %1441 }
0x131a   :  { %v1444_v49 = vmul.f32 %v2677_v31, %v1442_v48 }
0x131c   :  { %1548 = vrot.lane.b32.xlu0 %v1444_v49, %s2859_s16 }
0x1388   :  { %v1545_v50 = vpop.permute.xlu1 %1544 }
0x1389   :  { %2378 = vmatmul.mubr.msk.f32.vlgmr.msra.gmra.mrb[14].mxu1 %vm212_vm2, %v1545_v50 }
0x138a   :  { %2548 = vmatpush3.bf16.msra.mxu1 %v3038_v37  ;;  %2396 = vmatprep.mubr.msk.f32.mxu1 %vm2857_vm0, %v2858_v1  ;;  %v1649_v37 = vrot.slane %v3018_v16, 6 }
0x138b   :  { %2549 = vmatprep.subr.bf16.mxu1 %v2856_v0 }
0x138e   :  { %2551 = vmatpush3.bf16.msra.mxu1 %v3044_v39  ;;  %v1549_v51 = vpop.permute.xlu0 %1548 }
0x138f   :  { %2552 = vmatprep.subr.bf16.mxu1 %v2856_v0  ;;  %v1551_v52 = vsel %vm212_vm2, %v1545_v50, %v1549_v51 }
0x1390   :  { %2367 = vmatmul.mubr.msk.f32.vlgmr.msra.gmra.mrb[14].mxu0 %vm323_vm3, %v1551_v52 }
0x1391   :  { %2407 = vmatprep.mubr.msk.f32.mxu0 %vm2857_vm0, %v2858_v1 }
0x1392   :  { %2554 = vmatpush3.bf16.msra.mxu1 %v3054_v42 }
0x1393   :  { %2555 = vmatprep.subr.bf16.mxu1 %v2856_v0 }
0x1396   :  { %2557 = vmatpush3.bf16.msra.mxu1 %v3065_v46 }
0x145c   :  { %v1719_v53 = vpop.f32.mrb[14].mxu1 }
0x145d   :  { %v1720_v39 = vadd.f32 %v1719_v53, %v1649_v37  ;;  %v2379_v55 = vpop.f32.mrb[15].mxu1 }
0x145f   :  { %2682 = vtanh.f32 %v1720_v39  ;;  %v2026_v1 = vmul.f32 -1.442695, %v1720_v39 }
0x1463   :  { %v1621_v56 = vpop.f32.mrb[14].mxu0 }
0x1464   :  { %v1622_v57 = vadd.f32 %v3098_v54, %v1621_v56  ;;  %v2368_v58 = vpop.f32.mrb[15].mxu0 }
0x1466   :  { %2684 = vtanh.f32 %v1622_v57  ;;  %v2024_v46 = vmul.f32 -1.442695, %v1622_v57 }
0x1467   :  { %2686 = vpow2.f32 %v2026_v1 }
0x1468   :  { %2688 = vpow2.f32 %v2024_v46 }
0x1469   :  { %v2683_v59 = vpop.eup %2682 }
0x146a   :  { %1732 = vrot.lane.b32.xlu0 %v2683_v59, %s2859_s16 }
0x1470   :  { %v2685_v42 = vpop.eup %2684 }
0x1471   :  { %1634 = vrot.lane.b32.xlu1 %v2685_v42, %s2859_s16  ;;  %v2687_v16 = vpop.eup %2686 }
0x1472   :  { %v1726_v60 = vadd.f32 1.0, %v2687_v16  ;;  %v2689_v61 = vpop.eup %2688 }
0x1473   :  { %v1628_v62 = vadd.f32 1.0, %v2689_v61 }
0x1474   :  { %2690 = vrcp.f32 %v1726_v60 }
0x1475   :  { %2692 = vrcp.f32 %v1628_v62 }
0x147e   :  { %v2691_v63 = vpop.eup %2690 }
0x147f   :  { %v2693_v4 = vpop.eup %2692  ;;  %v1730_v7 = vmul.f32 %v2691_v63, %v1536_v36  ;;  %v1854_v36 = vld [vmem:[%s3387_s8 + $0x8] sm:$0xff] }
0x1480   :  { %v1632_v11 = vmul.f32 %v2693_v4, %v1438_v41  ;;  %v1856_v41 = vld [vmem:[%s3387_s8 + $0x18] sm:$0xff] }
0x1481   :  { %v2562_v43 = vpack.c.bf16 %v1856_v41, %v1855_v38 }
0x14dc   :  { %v1733_v2 = vpop.permute.xlu0 %1732 }
0x14dd   :  { %v1735_v3 = vmul.f32 %v2691_v63, %v1733_v2 }
0x14df   :  { %1737 = vrot.lane.b32.xlu0 %v1735_v3, %s2849_s27 }
0x14e3   :  { %v1635_v5 = vpop.permute.xlu1 %1634 }
0x14e4   :  { %v1637_v6 = vmul.f32 %v2693_v4, %v1635_v5 }
0x14e6   :  { %1639 = vrot.lane.b32.xlu1 %v1637_v6, %s2849_s27 }
0x1551   :  { %v1738_v9 = vpop.permute.xlu0 %1737 }
0x1552   :  { %v1740_v10 = vadd.f32 %v1738_v9, %v1730_v7 }
0x1554   :  { %2694 = vtanh.f32 %v1740_v10 }
0x1558   :  { %v1640_v13 = vpop.permute.xlu1 %1639 }
0x1559   :  { %v1642_v14 = vadd.f32 %v1640_v13, %v1632_v11 }
0x155b   :  { %2696 = vtanh.f32 %v1642_v14 }
0x155e   :  { %v2695_v8 = vpop.eup %2694 }
0x155f   :  { %1743 = vrot.lane.b32.xlu0 %v2695_v8, %s2859_s16 }
0x1565   :  { %v2697_v15 = vpop.eup %2696 }
0x1566   :  { %1645 = vrot.lane.b32.xlu1 %v2697_v15, %s2859_s16 }
0x15d1   :  { %v1744_v17 = vpop.permute.xlu0 %1743 }
0x15d2   :  { %v1746_v19 = vmul.f32 %v2691_v63, %v1744_v17 }
0x15d4   :  { %1748 = vrot.lane.b32.xlu1 %v1746_v19, %s2849_s27 }
0x15d8   :  { %v1646_v20 = vpop.permute.xlu1 %1645 }
0x15d9   :  { %v1648_v21 = vmul.f32 %v2693_v4, %v1646_v20 }
0x15db   :  { %1752 = vrot.lane.b32.xlu0 %v1648_v21, %s2859_s16 }
0x1646   :  { %v1749_v22 = vpop.permute.xlu1 %1748 }
0x1647   :  { %1955 = vst.msk [vmem:[#allocation11] sm:$0x3] %vm1954_vm4, %v1749_v22 }
0x164d   :  { %v1753_v12 = vpop.permute.xlu0 %1752 }
0x164e   :  { %v1755_v23 = vsel %vm212_vm2, %v1749_v22, %v1753_v12 }
0x164f   :  { %2397 = vmatmul.mubr.msk.f32.vlgmr.msra.gmra.mrb[16].mxu1 %vm323_vm3, %v1755_v23 }
0x1722   :  { %v1825_v24 = vpop.f32.mrb[16].mxu1 }
0x1723   :  { %v1826_v25 = vadd.f32 %v3098_v54, %v1825_v24  ;;  %v2398_v26 = vpop.f32.mrb[17].mxu1  ;;  %v1853_v54 = vld [vmem:[%s3387_s8] sm:$0xff]  ;;  %s2860_s8 = smov [#allocation11]  }
0x1724   :  { %v2559_v40 = vpack.c.bf16 %v1854_v36, %v1853_v54  ;;  %s1974_s0 = sshll.u32 %s2860_s8, 4  ;;  %s1975_s0 = int_to_ptr.vmem [resolvable:$true] %s1974_s0 }
0x1725   :  { %2698 = vtanh.f32 %v1826_v25  ;;  %v2028_v18 = vmul.f32 -1.442695, %v1826_v25  ;;  %s2794_s13 = scalar_lea.vmem %s1975_s0, 128  ;;  %p2799_p5 = scmp.lt.s32.totalorder %s1975_s0, %s1975_s0 }
0x1726   :  { %2560 = vmatpush3.bf16.msra.mxu0 %v2559_v40  ;;  %p2795_p4 = scmp.ne.s32.totalorder %s1975_s0, %s2794_s13  ;;  %p2800_p6 = scmp.lt.s32.totalorder %s2794_s13, %s2794_s13 }
0x1727   :  { %2700 = vpow2.f32 %v2028_v18  ;;  %2561 = vmatprep.subr.bf16.mxu0 %v2856_v0 }
0x1728   :  { %p2801_p7 = por %p2800_p6, %p2799_p5 }
0x172a   :  { %2563 = vmatpush3.bf16.msra.mxu0 %v2562_v43  ;;  %p2802_p8 = pnand %p2801_p7, %p2795_p4 }
0x172f   :  { %v2699_v27 = vpop.eup %2698 }
0x1730   :  { %1838 = vrot.lane.b32.xlu1 %v2699_v27, %s2859_s16 }
0x1731   :  { %v2701_v28 = vpop.eup %2700 }
0x1732   :  { %v1832_v29 = vadd.f32 1.0, %v2701_v28 }
0x1734   :  { %2702 = vrcp.f32 %v1832_v29 }
0x173e   :  { %v2703_v30 = vpop.eup %2702 }
0x173f   :  { %v1836_v33 = vmul.f32 %v2703_v30, %v1642_v14 }
0x17a2   :  { %v1839_v31 = vpop.permute.xlu1 %1838 }
0x17a3   :  { %v1841_v32 = vmul.f32 %v2703_v30, %v1839_v31 }
0x17a5   :  { %1843 = vrot.lane.b32.xlu0 %v1841_v32, %s2849_s27 }
0x1817   :  { %v1844_v34 = vpop.permute.xlu0 %1843 }
0x1818   :  { %v1846_v35 = vadd.f32 %v1844_v34, %v1836_v33 }
0x181a   :  { %2704 = vtanh.f32 %v1846_v35 }
0x1824   :  { %v2705_v44 = vpop.eup %2704 }
0x1825   :  { %1849 = vrot.lane.b32.xlu1 %v2705_v44, %s2859_s16 }
0x1829   :  { %1942 = vrot.lane.b32.xlu1 %v1740_v10, %s2859_s16 }
0x1897   :  { %v1850_v45 = vpop.permute.xlu1 %1849 }
0x1898   :  { %v1852_v47 = vmul.f32 %v2703_v30, %v1850_v45 }
0x189a   :  { %1865 = vrot.lane.b32.xlu0 %v1852_v47, %s2849_s27 }
0x189b   :  { %v1943_v48 = vpop.permute.xlu1 %1942 }
0x189c   :  { %1947 = vrot.lane.b32.xlu1 %v1943_v48, %s2849_s27 }
0x189e   :  { %1945 = vrot.lane.b32.xlu0 %v1846_v35, %s2859_s16 }
0x190c   :  { %v1866_v49 = vpop.permute.xlu0 %1865 }
0x190d   :  { %1956 = vst.msk [vmem:[#allocation11 + $0x2] sm:$0x3] %vm1954_vm4, %v1866_v49  ;;  %2408 = vmatmul.mubr.msk.f32.vlgmr.msra.gmra.mrb[16].mxu0 %vm212_vm2, %v1866_v49 }
0x190e   :  { %v1948_v0 = vpop.permute.xlu1 %1947 }
0x190f   :  { %1957 = vst.msk [vmem:[#allocation11 + $0x4] sm:$0x3] %vm1954_vm4, %v1948_v0 }
0x1910   :  { %v1946_v50 = vpop.permute.xlu0 %1945 }
0x1911   :  { %1949 = vrot.lane.b32.xlu0 %v1946_v50, %s2849_s27 }
0x1983   :  { %v1950_v51 = vpop.permute.xlu0 %1949 }
0x1984   :  { %1958 = vst.msk [vmem:[#allocation11 + $0x6] sm:$0x3] %vm1954_vm4, %v1950_v51 }
0x1985   :  { %2805 = shalt.err (!%p2802_p8)
}
0x1986   :  { %s2806_s22 = scalar_lea.hbm %s3390_s11, 128 }
0x1987   :  { %p2807_p9 = scmp.ne.s32.totalorder %s3390_s11, %s2806_s22  ;;  %p2810_p10 = scmp.lt.u32.totalorder %s2806_s22, %s3390_s11 }
0x1989   :  { %p2812_p11 = pnand %p2810_p10, %p2807_p9 }
0x198b   :  { %2815 = shalt.err (!%p2812_p11)
}
0x198c   :  { %1980 = dma.vmem_to_hbm [thread:$0]  %s1975_s0, 128, %s3390_s11, [#allocation12], %s2849_s27, %s2849_s27, %s2850_s28   ;;  %vm1939_vm5 = vcmask 123904  }
0x198d   :  { %v2029_v52 = vld [vmem:[%s3388_s9] ss:$0 sm:$0xff]  ;;  %s2861_s26 = smov [#allocation10]  }
0x198e   :  { %s1965_s4 = sshll.u32 %s2861_s26, 4  ;;  %s1966_s4 = int_to_ptr.vmem [resolvable:$true] %s1965_s4 }
0x198f   :  { %s2816_s1 = scalar_lea.vmem %s1966_s4, 32  ;;  %p2821_p13 = scmp.lt.s32.totalorder %s1966_s4, %s1966_s4 }
0x1990   :  { %p2817_p12 = scmp.ne.s32.totalorder %s1966_s4, %s2816_s1  ;;  %p2822_p0 = scmp.lt.s32.totalorder %s2816_s1, %s2816_s1 }
0x1992   :  { %p2823_p1 = por %p2822_p0, %p2821_p13 }
0x1994   :  { %p2824_p2 = pnand %p2823_p1, %p2817_p12 }
0x19e0   :  { %v1935_v37 = vpop.f32.mrb[16].mxu0 }
0x19e1   :  { %v1936_v53 = vadd.f32 %v2029_v52, %v1935_v37  ;;  %v2409_v39 = vpop.f32.mrb[17].mxu0 }
0x19e3   :  { %1940 = vst.msk [vmem:[#allocation10] sm:$0x3] %vm1939_vm5, %v1936_v53 }
0x19e4   :  { %2827 = shalt.err (!%p2824_p2)
}
0x19e5   :  { %s2828_s28 = scalar_lea.hbm %s3389_s10, 32 }
0x19e6   :  { %p2829_p3 = scmp.ne.s32.totalorder %s3389_s10, %s2828_s28  ;;  %p2832_p4 = scmp.lt.u32.totalorder %s2828_s28, %s3389_s10 }
0x19e8   :  { %p2834_p5 = pnand %p2832_p4, %p2829_p3 }
0x19ea   :  { %2837 = shalt.err (!%p2834_p5)
}
0x19eb   :  { %1968 = dma.vmem_to_hbm [thread:$0]  %s1966_s4, 32, %s3389_s10, [#allocation4]  }
0x19ec   :  { %2844 = dma.done.wait [#allocation4], 32  }
0x19ed   :  { %2845 = vsyncadd [#allocation4], 4294967264 }
0x19ee   :  { %2846 = dma.done.wait [#allocation12], 128  }
0x19ef   :  { %2847 = vsyncadd [#allocation12], 4294967168 }
0x19f0   :  { %1987 = vsyncpa [#allocation3], 1 }
0x19f1   :  { %1988 = vsyncpa [#allocation6], 1 }
0x19f2   :  { %1989 = vsyncpa [#allocation9], 1 }
0x19f3   :  { %1990 = vsyncpa [#allocation4], 1 }
0x19f4   :  { %1991 = vsyncpa [#allocation12], 1 }

</bundles_post_ra>
